<compile_context>
chip_gen: v6e
topology: v6e:2x2x1
jax: 0.10.0
libtpu: 0.0.40
codegen_flags: <defaults>
</compile_context>

<pallas_src>
import jax
import jax.numpy as jnp
import numpy as np
from jax.experimental import pallas as pl
from jax.experimental.pallas import tpu as pltpu

K = 5        # conv kernel size
PAD = 2      # padding=2 -> "same" output length
LANE = 128   # TPU lane width
ROW0 = 8     # sublane-aligned start row of the valid time window in scratch


def _round_up(x, m):
    return ((x + m - 1) // m) * m


# ---------------------------------------------------------------------------
# Fused PostNet kernel: 5 convs + tanh + bias + residual, all in VMEM.
# One grid step == one batch element.
# ---------------------------------------------------------------------------
def _postnet_fused_kernel(x_ref,
                          w0_ref, w1_ref, w2_ref, w3_ref, w4_ref,
                          b0_ref, b1_ref, b2_ref, b3_ref, b4_ref,
                          o_ref, act_a, act_b, cols_ref):
    # x_ref : (1, T, Cout)     one batch element, channel-padded NTC (residual)
    # w*_ref: (K*Cblk, C*)     bf16 im2col weight matrices (channel-padded)
    # b*_ref: (1, C*)          f32 channel-padded biases
    # o_ref : (1, T, Cout)     lane-dense output block (Cout multiple of 128)
    # act_a/act_b: (ROW0+T+PAD, Cblk) f32 ping-pong activation buffers w/ halos
    # cols_ref   : (T, K*Cblk) bf16 im2col slab (MXU lhs)
    _, t_len, c_out = o_ref.shape
    c_blk = act_a.shape[1]
    w_refs = (w0_ref, w1_ref, w2_ref, w3_ref, w4_ref)
    b_refs = (b0_ref, b1_ref, b2_ref, b3_ref, b4_ref)
    n_layers = len(w_refs)

    # Zero ONLY the conv halo rows; valid rows are fully rewritten every layer.
    halo = jnp.zeros((PAD, c_blk), jnp.float32)
    for buf in (act_a, act_b):
        buf[pl.ds(ROW0 - PAD, PAD), :] = halo
        buf[pl.ds(ROW0 + t_len, PAD), :] = halo

    # Layer-0 input: lane-padded x, remaining mid-feature lanes zero-filled
    # once (subsequent layers rewrite the full Cblk width).
    x0 = x_ref[0]                                           # (T, c_out) f32
    if c_out == c_blk:
        act_a[pl.ds(ROW0, t_len), :] = x0
    else:
        act_a[pl.ds(ROW0, t_len), pl.ds(0, c_out)] = x0
        act_a[pl.ds(ROW0, t_len), pl.ds(c_out, c_blk - c_out)] = (
            jnp.zeros((t_len, c_blk - c_out), jnp.float32))

    def build_im2col(src):
        # cols[:, k*Cblk:(k+1)*Cblk] = bf16(src[ROW0-PAD+k : ROW0-PAD+k+T, :])
        # All stores are 128-lane aligned full-width blocks.
        for k in range(K):
            cols_ref[:, pl.ds(k * c_blk, c_blk)] = (
                src[pl.ds(ROW0 - PAD + k, t_len), :].astype(cols_ref.dtype))

    src, dst = act_a, act_b
    for li in range(n_layers - 1):                          # conv + bias + tanh
        build_im2col(src)
        y = jnp.dot(cols_ref[...], w_refs[li][...],        # bf16 x bf16 -> f32
                    preferred_element_type=jnp.float32)
        dst[pl.ds(ROW0, t_len), :] = jnp.tanh(y + b_refs[li][...])
        src, dst = dst, src
        # Dropout(0.5): eval mode => identity.

    build_im2col(src)                                       # last conv, no tanh
    y = jnp.dot(cols_ref[...], w_refs[-1][...],
                preferred_element_type=jnp.float32)
    # Residual re-read at the end (not kept live across the five layers).
    res = x_ref[0]
    o_ref[0] = (y + b_refs[-1][...] + res).astype(o_ref.dtype)


# ---------------------------------------------------------------------------
# One-time parameter prep (hoisted out of the forward path).
# ---------------------------------------------------------------------------
def prepare_postnet_params(params, num_mels, mid_features):
    """PyTorch Conv1d weights (Cout, Cin, K) -> bf16 MXU im2col matrices.

    Returns (weights, biases):
      weights[i]: bf16 (K*Cblk, Cblk)  for i < L-1,  (K*Cblk, CoutPad) last
      biases[i] : f32  (1, Cblk) / (1, CoutPad)
    with Cblk = round_up(mid_features, 128), CoutPad = round_up(num_mels, 128),
    zero padding everywhere so padded channels stay exactly zero through tanh.
    """
    assert num_mels <= mid_features, "kernel assumes num_mels <= mid_features"
    n_layers = len(params)
    c_blk = _round_up(mid_features, LANE)
    c_out_pad = _round_up(num_mels, LANE)
    ws, bs = [], []
    for i, (w, b) in enumerate(params):
        cout, cin, k = w.shape
        assert k == K
        tgt_cout = c_out_pad if i == n_layers - 1 else c_blk
        w_kic = jnp.transpose(w, (2, 1, 0))                      # (K, Cin, Cout)
        w_pad = jnp.zeros((K, c_blk, tgt_cout), jnp.float32)
        w_pad = w_pad.at[:, :cin, :cout].set(w_kic)
        ws.append(w_pad.reshape(K * c_blk, tgt_cout).astype(jnp.bfloat16))
        b_pad = jnp.zeros((1, tgt_cout), jnp.float32).at[0, :cout].set(b)
        bs.append(b_pad)
    return ws, bs


# ---------------------------------------------------------------------------
# Forward wrapper: output = pre_output + PostNet(pre_output)  (NCT in / out)
# ---------------------------------------------------------------------------
def postnet_residual_forward(pre_output_nct, prepped_w, prepped_b):
    N, num_mels, T = pre_output_nct.shape
    c_blk = prepped_w[0].shape[0] // K
    c_out = prepped_w[-1].shape[1]

    # NCT -> NTC + lane pad (single layout pass); channels padded only to the
    # 128-multiple *output* width — the wider mid_features lanes are zero-filled
    # inside the kernel, so no mid_features-wide HBM slab is ever written.
    x = jnp.transpose(pre_output_nct, (0, 2, 1))
    x = jnp.pad(x, ((0, 0), (0, 0), (0, c_out - num_mels)))

    t_buf = ROW0 + T + PAD
    out_pad = pl.pallas_call(
        _postnet_fused_kernel,
        out_shape=jax.ShapeDtypeStruct((N, T, c_out), x.dtype),
        grid=(N,),                                     # one step per batch elem
        in_specs=(
            [pl.BlockSpec((1, T, c_out), lambda n: (n, 0, 0))]
            + [pl.BlockSpec(w.shape, lambda n: (0, 0)) for w in prepped_w]
            + [pl.BlockSpec(b.shape, lambda n: (0, 0)) for b in prepped_b]
        ),
        out_specs=pl.BlockSpec((1, T, c_out), lambda n: (n, 0, 0)),
        scratch_shapes=[
            pltpu.VMEM((t_buf, c_blk), jnp.float32),      # activation ping
            pltpu.VMEM((t_buf, c_blk), jnp.float32),      # activation pong
            pltpu.VMEM((T, K * c_blk), jnp.bfloat16),     # bf16 im2col slab
        ],
        compiler_params=pltpu.CompilerParams(
            dimension_semantics=("parallel",),            # megacore over batch
            vmem_limit_bytes=32 * 1024 * 1024),
    )(x, *prepped_w, *prepped_b)

    out = out_pad[:, :, :num_mels]                        # drop lane pad
    return jnp.transpose(out, (0, 2, 1))                  # NTC -> NCT


# ---------------------------------------------------------------------------
# Pure-JAX reference (f32, HIGHEST precision) for correctness check
# ---------------------------------------------------------------------------
def postnet_residual_ref(pre_output_nct, params):
    x = jnp.transpose(pre_output_nct, (0, 2, 1))
    residual = x
    for i, (w, b) in enumerate(params):
        w_kic = jnp.transpose(w, (2, 1, 0))
        N, T, _ = x.shape
        xp = jnp.pad(x, ((0, 0), (PAD, PAD), (0, 0)))
        y = jnp.zeros((N, T, w.shape[0]), jnp.float32)
        for k in range(K):
            y = y + jnp.einsum('nti,io->nto', xp[:, k:k + T, :], w_kic[k],
                               precision=jax.lax.Precision.HIGHEST)
        y = y + b[None, None, :]
        x = jnp.tanh(y) if i != len(params) - 1 else y
    return jnp.transpose(residual + x, (0, 2, 1))


# ---------------------------------------------------------------------------
if __name__ == "__main__":
    num_mels = 16      # model.num_mels
    mid_features = 32  # model.base_features
    num_layers = 5
    N, T = 2, 32       # batch, spectrogram frames (T multiple of 16 for bf16)

    key = jax.random.PRNGKey(0)

    # Deterministic parameter init matching PyTorch Conv1d shapes (Cout, Cin, K).
    params = []
    in_c = num_mels
    for i in range(num_layers):
        out_c = mid_features if i < num_layers - 1 else num_mels
        key, kw, kb = jax.random.split(key, 3)
        fan_in = in_c * K
        fan_out = out_c * K
        limit = jnp.sqrt(6.0 / (fan_in + fan_out))
        w = jax.random.uniform(kw, (out_c, in_c, K), jnp.float32, -limit, limit)
        b = jax.random.uniform(kb, (out_c,), jnp.float32, -0.1, 0.1)
        params.append((w, b))
        in_c = out_c

    # pre_output: decoder output spectrogram, PyTorch NCT layout (N, num_mels, T)
    key, kx = jax.random.split(key)
    pre_output = jax.random.normal(kx, (N, num_mels, T), jnp.float32)

    # One-time weight prep (bf16), hoisted out of the forward path.
    prepped_w, prepped_b = prepare_postnet_params(params, num_mels, mid_features)
    prepped_w = [jax.device_put(w) for w in prepped_w]
    prepped_b = [jax.device_put(b) for b in prepped_b]

    fwd = jax.jit(lambda x: postnet_residual_forward(x, prepped_w, prepped_b))
    out = jax.block_until_ready(fwd(pre_output))

    ref = postnet_residual_ref(pre_output, params)
    # bf16 MXU operands (f32 accumulate) through 5 stacked convs: loosened tol.
    np.testing.assert_allclose(np.asarray(out), np.asarray(ref),
                               rtol=3e-2, atol=3e-2)

    print("KERNEL_OK")
</pallas_src>

<mosaic_0001>
module attributes {stable_mosaic.version = 11 : i64} {
  func.func @_postnet_fused_kernel(%arg0: i32, %arg1: memref<1x32x128xf32, #tpu.memory_space<vmem>>, %arg2: memref<640x128xbf16, #tpu.memory_space<vmem>>, %arg3: memref<640x128xbf16, #tpu.memory_space<vmem>>, %arg4: memref<640x128xbf16, #tpu.memory_space<vmem>>, %arg5: memref<640x128xbf16, #tpu.memory_space<vmem>>, %arg6: memref<640x128xbf16, #tpu.memory_space<vmem>>, %arg7: memref<1x128xf32, #tpu.memory_space<vmem>>, %arg8: memref<1x128xf32, #tpu.memory_space<vmem>>, %arg9: memref<1x128xf32, #tpu.memory_space<vmem>>, %arg10: memref<1x128xf32, #tpu.memory_space<vmem>>, %arg11: memref<1x128xf32, #tpu.memory_space<vmem>>, %arg12: memref<1x32x128xf32, #tpu.memory_space<vmem>>, %arg13: memref<42x128xf32, #tpu.memory_space<vmem>>, %arg14: memref<42x128xf32, #tpu.memory_space<vmem>>, %arg15: memref<32x640xbf16, #tpu.memory_space<vmem>>) attributes {dimension_semantics = [#tpu.dimension_semantics<parallel>], iteration_bounds = array<i64: 2>, scalar_prefetch = 0 : i64, scratch_operands = 3 : i64, tpu.core_type = #tpu.core_type<tc>, window_params = [{transform_indices = @transform_0, window_bounds = array<i64: 1, 32, 128>}, {pipeline_mode = #tpu.pipeline_mode<synchronous>, transform_indices = @transform_1, window_bounds = array<i64: 640, 128>}, {pipeline_mode = #tpu.pipeline_mode<synchronous>, transform_indices = @transform_2, window_bounds = array<i64: 640, 128>}, {pipeline_mode = #tpu.pipeline_mode<synchronous>, transform_indices = @transform_3, window_bounds = array<i64: 640, 128>}, {pipeline_mode = #tpu.pipeline_mode<synchronous>, transform_indices = @transform_4, window_bounds = array<i64: 640, 128>}, {pipeline_mode = #tpu.pipeline_mode<synchronous>, transform_indices = @transform_5, window_bounds = array<i64: 640, 128>}, {pipeline_mode = #tpu.pipeline_mode<synchronous>, transform_indices = @transform_6, window_bounds = array<i64: 1, 128>}, {pipeline_mode = #tpu.pipeline_mode<synchronous>, transform_indices = @transform_7, window_bounds = array<i64: 1, 128>}, {pipeline_mode = #tpu.pipeline_mode<synchronous>, transform_indices = @transform_8, window_bounds = array<i64: 1, 128>}, {pipeline_mode = #tpu.pipeline_mode<synchronous>, transform_indices = @transform_9, window_bounds = array<i64: 1, 128>}, {pipeline_mode = #tpu.pipeline_mode<synchronous>, transform_indices = @transform_10, window_bounds = array<i64: 1, 128>}, {transform_indices = @transform_11, window_bounds = array<i64: 1, 32, 128>}]} {
    %cst = arith.constant 0.000000e+00 : f32
    %0 = vector.broadcast %cst : f32 to vector<2x128xf32>
    %c6 = arith.constant 6 : index
    %c0 = arith.constant 0 : index
    %1 = vector.load %arg13[%c6, %c0] : memref<42x128xf32, #tpu.memory_space<vmem>>, vector<2x128xf32>
    tpu.vector_store %arg13[%c6, %c0], %0 {strides = array<i32>} : memref<42x128xf32, #tpu.memory_space<vmem>>, vector<2x128xf32>,
    %c40 = arith.constant 40 : index
    %c0_0 = arith.constant 0 : index
    %2 = vector.load %arg13[%c40, %c0_0] : memref<42x128xf32, #tpu.memory_space<vmem>>, vector<2x128xf32>
    tpu.vector_store %arg13[%c40, %c0_0], %0 {strides = array<i32>} : memref<42x128xf32, #tpu.memory_space<vmem>>, vector<2x128xf32>,
    %c6_1 = arith.constant 6 : index
    %c0_2 = arith.constant 0 : index
    %3 = vector.load %arg14[%c6_1, %c0_2] : memref<42x128xf32, #tpu.memory_space<vmem>>, vector<2x128xf32>
    tpu.vector_store %arg14[%c6_1, %c0_2], %0 {strides = array<i32>} : memref<42x128xf32, #tpu.memory_space<vmem>>, vector<2x128xf32>,
    %c40_3 = arith.constant 40 : index
    %c0_4 = arith.constant 0 : index
    %4 = vector.load %arg14[%c40_3, %c0_4] : memref<42x128xf32, #tpu.memory_space<vmem>>, vector<2x128xf32>
    tpu.vector_store %arg14[%c40_3, %c0_4], %0 {strides = array<i32>} : memref<42x128xf32, #tpu.memory_space<vmem>>, vector<2x128xf32>,
    %c0_5 = arith.constant 0 : index
    %c0_6 = arith.constant 0 : index
    %c0_7 = arith.constant 0 : index
    %5 = vector.load %arg1[%c0_5, %c0_6, %c0_7] : memref<1x32x128xf32, #tpu.memory_space<vmem>>, vector<1x32x128xf32>
    %6 = vector.shape_cast %5 : vector<1x32x128xf32> to vector<32x128xf32>
    %c8 = arith.constant 8 : index
    %c0_8 = arith.constant 0 : index
    %7 = vector.load %arg13[%c8, %c0_8] : memref<42x128xf32, #tpu.memory_space<vmem>>, vector<32x128xf32>
    tpu.vector_store %arg13[%c8, %c0_8], %6 {strides = array<i32>} : memref<42x128xf32, #tpu.memory_space<vmem>>, vector<32x128xf32>,
    %c6_9 = arith.constant 6 : index
    %c0_10 = arith.constant 0 : index
    %8 = vector.load %arg13[%c6_9, %c0_10] : memref<42x128xf32, #tpu.memory_space<vmem>>, vector<32x128xf32>
    %9 = arith.truncf %8 : vector<32x128xf32> to vector<32x128xbf16>
    %c0_11 = arith.constant 0 : index
    %c0_12 = arith.constant 0 : index
    %10 = vector.load %arg15[%c0_11, %c0_12] : memref<32x640xbf16, #tpu.memory_space<vmem>>, vector<32x128xbf16>
    tpu.vector_store %arg15[%c0_11, %c0_12], %9 {strides = array<i32>} : memref<32x640xbf16, #tpu.memory_space<vmem>>, vector<32x128xbf16>,
    %c7 = arith.constant 7 : index
    %c0_13 = arith.constant 0 : index
    %11 = vector.load %arg13[%c7, %c0_13] : memref<42x128xf32, #tpu.memory_space<vmem>>, vector<32x128xf32>
    %12 = arith.truncf %11 : vector<32x128xf32> to vector<32x128xbf16>
    %c0_14 = arith.constant 0 : index
    %c128 = arith.constant 128 : index
    %13 = vector.load %arg15[%c0_14, %c128] : memref<32x640xbf16, #tpu.memory_space<vmem>>, vector<32x128xbf16>
    tpu.vector_store %arg15[%c0_14, %c128], %12 {strides = array<i32>} : memref<32x640xbf16, #tpu.memory_space<vmem>>, vector<32x128xbf16>,
    %c8_15 = arith.constant 8 : index
    %c0_16 = arith.constant 0 : index
    %14 = vector.load %arg13[%c8_15, %c0_16] : memref<42x128xf32, #tpu.memory_space<vmem>>, vector<32x128xf32>
    %15 = arith.truncf %14 : vector<32x128xf32> to vector<32x128xbf16>
    %c0_17 = arith.constant 0 : index
    %c256 = arith.constant 256 : index
    %16 = vector.load %arg15[%c0_17, %c256] : memref<32x640xbf16, #tpu.memory_space<vmem>>, vector<32x128xbf16>
    tpu.vector_store %arg15[%c0_17, %c256], %15 {strides = array<i32>} : memref<32x640xbf16, #tpu.memory_space<vmem>>, vector<32x128xbf16>,
    %c9 = arith.constant 9 : index
    %c0_18 = arith.constant 0 : index
    %17 = vector.load %arg13[%c9, %c0_18] : memref<42x128xf32, #tpu.memory_space<vmem>>, vector<32x128xf32>
    %18 = arith.truncf %17 : vector<32x128xf32> to vector<32x128xbf16>
    %c0_19 = arith.constant 0 : index
    %c384 = arith.constant 384 : index
    %19 = vector.load %arg15[%c0_19, %c384] : memref<32x640xbf16, #tpu.memory_space<vmem>>, vector<32x128xbf16>
    tpu.vector_store %arg15[%c0_19, %c384], %18 {strides = array<i32>} : memref<32x640xbf16, #tpu.memory_space<vmem>>, vector<32x128xbf16>,
    %c10 = arith.constant 10 : index
    %c0_20 = arith.constant 0 : index
    %20 = vector.load %arg13[%c10, %c0_20] : memref<42x128xf32, #tpu.memory_space<vmem>>, vector<32x128xf32>
    %21 = arith.truncf %20 : vector<32x128xf32> to vector<32x128xbf16>
    %c0_21 = arith.constant 0 : index
    %c512 = arith.constant 512 : index
    %22 = vector.load %arg15[%c0_21, %c512] : memref<32x640xbf16, #tpu.memory_space<vmem>>, vector<32x128xbf16>
    tpu.vector_store %arg15[%c0_21, %c512], %21 {strides = array<i32>} : memref<32x640xbf16, #tpu.memory_space<vmem>>, vector<32x128xbf16>,
    %c0_22 = arith.constant 0 : index
    %c0_23 = arith.constant 0 : index
    %23 = vector.load %arg15[%c0_22, %c0_23] : memref<32x640xbf16, #tpu.memory_space<vmem>>, vector<32x640xbf16>
    %c0_24 = arith.constant 0 : index
    %c0_25 = arith.constant 0 : index
    %24 = vector.load %arg2[%c0_24, %c0_25] : memref<640x128xbf16, #tpu.memory_space<vmem>>, vector<640x128xbf16>
    %cst_26 = arith.constant dense<0.000000e+00> : vector<32x128xf32>
    %25 = tpu.matmul %23, %24, %cst_26 {dimension_numbers = #tpu.dot_dimension_numbers<[1], [0], [0], [1], [0, 0, 1, 1], [], []>} : vector<32x640xbf16>, vector<640x128xbf16>, vector<32x128xf32> -> vector<32x128xf32>
    %c0_27 = arith.constant 0 : index
    %c0_28 = arith.constant 0 : index
    %26 = vector.load %arg7[%c0_27, %c0_28] : memref<1x128xf32, #tpu.memory_space<vmem>>, vector<1x128xf32>
    %27 = vector.broadcast %26 : vector<1x128xf32> to vector<32x128xf32>
    %28 = arith.addf %25, %27 : vector<32x128xf32>
    %29 = math.tanh %28 : vector<32x128xf32>
    %c8_29 = arith.constant 8 : index
    %c0_30 = arith.constant 0 : index
    %30 = vector.load %arg14[%c8_29, %c0_30] : memref<42x128xf32, #tpu.memory_space<vmem>>, vector<32x128xf32>
    tpu.vector_store %arg14[%c8_29, %c0_30], %29 {strides = array<i32>} : memref<42x128xf32, #tpu.memory_space<vmem>>, vector<32x128xf32>,
    %c6_31 = arith.constant 6 : index
    %c0_32 = arith.constant 0 : index
    %31 = vector.load %arg14[%c6_31, %c0_32] : memref<42x128xf32, #tpu.memory_space<vmem>>, vector<32x128xf32>
    %32 = arith.truncf %31 : vector<32x128xf32> to vector<32x128xbf16>
    %c0_33 = arith.constant 0 : index
    %c0_34 = arith.constant 0 : index
    %33 = vector.load %arg15[%c0_33, %c0_34] : memref<32x640xbf16, #tpu.memory_space<vmem>>, vector<32x128xbf16>
    tpu.vector_store %arg15[%c0_33, %c0_34], %32 {strides = array<i32>} : memref<32x640xbf16, #tpu.memory_space<vmem>>, vector<32x128xbf16>,
    %c7_35 = arith.constant 7 : index
    %c0_36 = arith.constant 0 : index
    %34 = vector.load %arg14[%c7_35, %c0_36] : memref<42x128xf32, #tpu.memory_space<vmem>>, vector<32x128xf32>
    %35 = arith.truncf %34 : vector<32x128xf32> to vector<32x128xbf16>
    %c0_37 = arith.constant 0 : index
    %c128_38 = arith.constant 128 : index
    %36 = vector.load %arg15[%c0_37, %c128_38] : memref<32x640xbf16, #tpu.memory_space<vmem>>, vector<32x128xbf16>
    tpu.vector_store %arg15[%c0_37, %c128_38], %35 {strides = array<i32>} : memref<32x640xbf16, #tpu.memory_space<vmem>>, vector<32x128xbf16>,
    %c8_39 = arith.constant 8 : index
    %c0_40 = arith.constant 0 : index
    %37 = vector.load %arg14[%c8_39, %c0_40] : memref<42x128xf32, #tpu.memory_space<vmem>>, vector<32x128xf32>
    %38 = arith.truncf %37 : vector<32x128xf32> to vector<32x128xbf16>
    %c0_41 = arith.constant 0 : index
    %c256_42 = arith.constant 256 : index
    %39 = vector.load %arg15[%c0_41, %c256_42] : memref<32x640xbf16, #tpu.memory_space<vmem>>, vector<32x128xbf16>
    tpu.vector_store %arg15[%c0_41, %c256_42], %38 {strides = array<i32>} : memref<32x640xbf16, #tpu.memory_space<vmem>>, vector<32x128xbf16>,
    %c9_43 = arith.constant 9 : index
    %c0_44 = arith.constant 0 : index
    %40 = vector.load %arg14[%c9_43, %c0_44] : memref<42x128xf32, #tpu.memory_space<vmem>>, vector<32x128xf32>
    %41 = arith.truncf %40 : vector<32x128xf32> to vector<32x128xbf16>
    %c0_45 = arith.constant 0 : index
    %c384_46 = arith.constant 384 : index
    %42 = vector.load %arg15[%c0_45, %c384_46] : memref<32x640xbf16, #tpu.memory_space<vmem>>, vector<32x128xbf16>
    tpu.vector_store %arg15[%c0_45, %c384_46], %41 {strides = array<i32>} : memref<32x640xbf16, #tpu.memory_space<vmem>>, vector<32x128xbf16>,
    %c10_47 = arith.constant 10 : index
    %c0_48 = arith.constant 0 : index
    %43 = vector.load %arg14[%c10_47, %c0_48] : memref<42x128xf32, #tpu.memory_space<vmem>>, vector<32x128xf32>
    %44 = arith.truncf %43 : vector<32x128xf32> to vector<32x128xbf16>
    %c0_49 = arith.constant 0 : index
    %c512_50 = arith.constant 512 : index
    %45 = vector.load %arg15[%c0_49, %c512_50] : memref<32x640xbf16, #tpu.memory_space<vmem>>, vector<32x128xbf16>
    tpu.vector_store %arg15[%c0_49, %c512_50], %44 {strides = array<i32>} : memref<32x640xbf16, #tpu.memory_space<vmem>>, vector<32x128xbf16>,
    %c0_51 = arith.constant 0 : index
    %c0_52 = arith.constant 0 : index
    %46 = vector.load %arg15[%c0_51, %c0_52] : memref<32x640xbf16, #tpu.memory_space<vmem>>, vector<32x640xbf16>
    %c0_53 = arith.constant 0 : index
    %c0_54 = arith.constant 0 : index
    %47 = vector.load %arg3[%c0_53, %c0_54] : memref<640x128xbf16, #tpu.memory_space<vmem>>, vector<640x128xbf16>
    %cst_55 = arith.constant dense<0.000000e+00> : vector<32x128xf32>
    %48 = tpu.matmul %46, %47, %cst_55 {dimension_numbers = #tpu.dot_dimension_numbers<[1], [0], [0], [1], [0, 0, 1, 1], [], []>} : vector<32x640xbf16>, vector<640x128xbf16>, vector<32x128xf32> -> vector<32x128xf32>
    %c0_56 = arith.constant 0 : index
    %c0_57 = arith.constant 0 : index
    %49 = vector.load %arg8[%c0_56, %c0_57] : memref<1x128xf32, #tpu.memory_space<vmem>>, vector<1x128xf32>
    %50 = vector.broadcast %49 : vector<1x128xf32> to vector<32x128xf32>
    %51 = arith.addf %48, %50 : vector<32x128xf32>
    %52 = math.tanh %51 : vector<32x128xf32>
    %c8_58 = arith.constant 8 : index
    %c0_59 = arith.constant 0 : index
    %53 = vector.load %arg13[%c8_58, %c0_59] : memref<42x128xf32, #tpu.memory_space<vmem>>, vector<32x128xf32>
    tpu.vector_store %arg13[%c8_58, %c0_59], %52 {strides = array<i32>} : memref<42x128xf32, #tpu.memory_space<vmem>>, vector<32x128xf32>,
    %c6_60 = arith.constant 6 : index
    %c0_61 = arith.constant 0 : index
    %54 = vector.load %arg13[%c6_60, %c0_61] : memref<42x128xf32, #tpu.memory_space<vmem>>, vector<32x128xf32>
    %55 = arith.truncf %54 : vector<32x128xf32> to vector<32x128xbf16>
    %c0_62 = arith.constant 0 : index
    %c0_63 = arith.constant 0 : index
    %56 = vector.load %arg15[%c0_62, %c0_63] : memref<32x640xbf16, #tpu.memory_space<vmem>>, vector<32x128xbf16>
    tpu.vector_store %arg15[%c0_62, %c0_63], %55 {strides = array<i32>} : memref<32x640xbf16, #tpu.memory_space<vmem>>, vector<32x128xbf16>,
    %c7_64 = arith.constant 7 : index
    %c0_65 = arith.constant 0 : index
    %57 = vector.load %arg13[%c7_64, %c0_65] : memref<42x128xf32, #tpu.memory_space<vmem>>, vector<32x128xf32>
    %58 = arith.truncf %57 : vector<32x128xf32> to vector<32x128xbf16>
    %c0_66 = arith.constant 0 : index
    %c128_67 = arith.constant 128 : index
    %59 = vector.load %arg15[%c0_66, %c128_67] : memref<32x640xbf16, #tpu.memory_space<vmem>>, vector<32x128xbf16>
    tpu.vector_store %arg15[%c0_66, %c128_67], %58 {strides = array<i32>} : memref<32x640xbf16, #tpu.memory_space<vmem>>, vector<32x128xbf16>,
    %c8_68 = arith.constant 8 : index
    %c0_69 = arith.constant 0 : index
    %60 = vector.load %arg13[%c8_68, %c0_69] : memref<42x128xf32, #tpu.memory_space<vmem>>, vector<32x128xf32>
    %61 = arith.truncf %60 : vector<32x128xf32> to vector<32x128xbf16>
    %c0_70 = arith.constant 0 : index
    %c256_71 = arith.constant 256 : index
    %62 = vector.load %arg15[%c0_70, %c256_71] : memref<32x640xbf16, #tpu.memory_space<vmem>>, vector<32x128xbf16>
    tpu.vector_store %arg15[%c0_70, %c256_71], %61 {strides = array<i32>} : memref<32x640xbf16, #tpu.memory_space<vmem>>, vector<32x128xbf16>,
    %c9_72 = arith.constant 9 : index
    %c0_73 = arith.constant 0 : index
    %63 = vector.load %arg13[%c9_72, %c0_73] : memref<42x128xf32, #tpu.memory_space<vmem>>, vector<32x128xf32>
    %64 = arith.truncf %63 : vector<32x128xf32> to vector<32x128xbf16>
    %c0_74 = arith.constant 0 : index
    %c384_75 = arith.constant 384 : index
    %65 = vector.load %arg15[%c0_74, %c384_75] : memref<32x640xbf16, #tpu.memory_space<vmem>>, vector<32x128xbf16>
    tpu.vector_store %arg15[%c0_74, %c384_75], %64 {strides = array<i32>} : memref<32x640xbf16, #tpu.memory_space<vmem>>, vector<32x128xbf16>,
    %c10_76 = arith.constant 10 : index
    %c0_77 = arith.constant 0 : index
    %66 = vector.load %arg13[%c10_76, %c0_77] : memref<42x128xf32, #tpu.memory_space<vmem>>, vector<32x128xf32>
    %67 = arith.truncf %66 : vector<32x128xf32> to vector<32x128xbf16>
    %c0_78 = arith.constant 0 : index
    %c512_79 = arith.constant 512 : index
    %68 = vector.load %arg15[%c0_78, %c512_79] : memref<32x640xbf16, #tpu.memory_space<vmem>>, vector<32x128xbf16>
    tpu.vector_store %arg15[%c0_78, %c512_79], %67 {strides = array<i32>} : memref<32x640xbf16, #tpu.memory_space<vmem>>, vector<32x128xbf16>,
    %c0_80 = arith.constant 0 : index
    %c0_81 = arith.constant 0 : index
    %69 = vector.load %arg15[%c0_80, %c0_81] : memref<32x640xbf16, #tpu.memory_space<vmem>>, vector<32x640xbf16>
    %c0_82 = arith.constant 0 : index
    %c0_83 = arith.constant 0 : index
    %70 = vector.load %arg4[%c0_82, %c0_83] : memref<640x128xbf16, #tpu.memory_space<vmem>>, vector<640x128xbf16>
    %cst_84 = arith.constant dense<0.000000e+00> : vector<32x128xf32>
    %71 = tpu.matmul %69, %70, %cst_84 {dimension_numbers = #tpu.dot_dimension_numbers<[1], [0], [0], [1], [0, 0, 1, 1], [], []>} : vector<32x640xbf16>, vector<640x128xbf16>, vector<32x128xf32> -> vector<32x128xf32>
    %c0_85 = arith.constant 0 : index
    %c0_86 = arith.constant 0 : index
    %72 = vector.load %arg9[%c0_85, %c0_86] : memref<1x128xf32, #tpu.memory_space<vmem>>, vector<1x128xf32>
    %73 = vector.broadcast %72 : vector<1x128xf32> to vector<32x128xf32>
    %74 = arith.addf %71, %73 : vector<32x128xf32>
    %75 = math.tanh %74 : vector<32x128xf32>
    %c8_87 = arith.constant 8 : index
    %c0_88 = arith.constant 0 : index
    %76 = vector.load %arg14[%c8_87, %c0_88] : memref<42x128xf32, #tpu.memory_space<vmem>>, vector<32x128xf32>
    tpu.vector_store %arg14[%c8_87, %c0_88], %75 {strides = array<i32>} : memref<42x128xf32, #tpu.memory_space<vmem>>, vector<32x128xf32>,
    %c6_89 = arith.constant 6 : index
    %c0_90 = arith.constant 0 : index
    %77 = vector.load %arg14[%c6_89, %c0_90] : memref<42x128xf32, #tpu.memory_space<vmem>>, vector<32x128xf32>
    %78 = arith.truncf %77 : vector<32x128xf32> to vector<32x128xbf16>
    %c0_91 = arith.constant 0 : index
    %c0_92 = arith.constant 0 : index
    %79 = vector.load %arg15[%c0_91, %c0_92] : memref<32x640xbf16, #tpu.memory_space<vmem>>, vector<32x128xbf16>
    tpu.vector_store %arg15[%c0_91, %c0_92], %78 {strides = array<i32>} : memref<32x640xbf16, #tpu.memory_space<vmem>>, vector<32x128xbf16>,
    %c7_93 = arith.constant 7 : index
    %c0_94 = arith.constant 0 : index
    %80 = vector.load %arg14[%c7_93, %c0_94] : memref<42x128xf32, #tpu.memory_space<vmem>>, vector<32x128xf32>
    %81 = arith.truncf %80 : vector<32x128xf32> to vector<32x128xbf16>
    %c0_95 = arith.constant 0 : index
    %c128_96 = arith.constant 128 : index
    %82 = vector.load %arg15[%c0_95, %c128_96] : memref<32x640xbf16, #tpu.memory_space<vmem>>, vector<32x128xbf16>
    tpu.vector_store %arg15[%c0_95, %c128_96], %81 {strides = array<i32>} : memref<32x640xbf16, #tpu.memory_space<vmem>>, vector<32x128xbf16>,
    %c8_97 = arith.constant 8 : index
    %c0_98 = arith.constant 0 : index
    %83 = vector.load %arg14[%c8_97, %c0_98] : memref<42x128xf32, #tpu.memory_space<vmem>>, vector<32x128xf32>
    %84 = arith.truncf %83 : vector<32x128xf32> to vector<32x128xbf16>
    %c0_99 = arith.constant 0 : index
    %c256_100 = arith.constant 256 : index
    %85 = vector.load %arg15[%c0_99, %c256_100] : memref<32x640xbf16, #tpu.memory_space<vmem>>, vector<32x128xbf16>
    tpu.vector_store %arg15[%c0_99, %c256_100], %84 {strides = array<i32>} : memref<32x640xbf16, #tpu.memory_space<vmem>>, vector<32x128xbf16>,
    %c9_101 = arith.constant 9 : index
    %c0_102 = arith.constant 0 : index
    %86 = vector.load %arg14[%c9_101, %c0_102] : memref<42x128xf32, #tpu.memory_space<vmem>>, vector<32x128xf32>
    %87 = arith.truncf %86 : vector<32x128xf32> to vector<32x128xbf16>
    %c0_103 = arith.constant 0 : index
    %c384_104 = arith.constant 384 : index
    %88 = vector.load %arg15[%c0_103, %c384_104] : memref<32x640xbf16, #tpu.memory_space<vmem>>, vector<32x128xbf16>
    tpu.vector_store %arg15[%c0_103, %c384_104], %87 {strides = array<i32>} : memref<32x640xbf16, #tpu.memory_space<vmem>>, vector<32x128xbf16>,
    %c10_105 = arith.constant 10 : index
    %c0_106 = arith.constant 0 : index
    %89 = vector.load %arg14[%c10_105, %c0_106] : memref<42x128xf32, #tpu.memory_space<vmem>>, vector<32x128xf32>
    %90 = arith.truncf %89 : vector<32x128xf32> to vector<32x128xbf16>
    %c0_107 = arith.constant 0 : index
    %c512_108 = arith.constant 512 : index
    %91 = vector.load %arg15[%c0_107, %c512_108] : memref<32x640xbf16, #tpu.memory_space<vmem>>, vector<32x128xbf16>
    tpu.vector_store %arg15[%c0_107, %c512_108], %90 {strides = array<i32>} : memref<32x640xbf16, #tpu.memory_space<vmem>>, vector<32x128xbf16>,
    %c0_109 = arith.constant 0 : index
    %c0_110 = arith.constant 0 : index
    %92 = vector.load %arg15[%c0_109, %c0_110] : memref<32x640xbf16, #tpu.memory_space<vmem>>, vector<32x640xbf16>
    %c0_111 = arith.constant 0 : index
    %c0_112 = arith.constant 0 : index
    %93 = vector.load %arg5[%c0_111, %c0_112] : memref<640x128xbf16, #tpu.memory_space<vmem>>, vector<640x128xbf16>
    %cst_113 = arith.constant dense<0.000000e+00> : vector<32x128xf32>
    %94 = tpu.matmul %92, %93, %cst_113 {dimension_numbers = #tpu.dot_dimension_numbers<[1], [0], [0], [1], [0, 0, 1, 1], [], []>} : vector<32x640xbf16>, vector<640x128xbf16>, vector<32x128xf32> -> vector<32x128xf32>
    %c0_114 = arith.constant 0 : index
    %c0_115 = arith.constant 0 : index
    %95 = vector.load %arg10[%c0_114, %c0_115] : memref<1x128xf32, #tpu.memory_space<vmem>>, vector<1x128xf32>
    %96 = vector.broadcast %95 : vector<1x128xf32> to vector<32x128xf32>
    %97 = arith.addf %94, %96 : vector<32x128xf32>
    %98 = math.tanh %97 : vector<32x128xf32>
    %c8_116 = arith.constant 8 : index
    %c0_117 = arith.constant 0 : index
    %99 = vector.load %arg13[%c8_116, %c0_117] : memref<42x128xf32, #tpu.memory_space<vmem>>, vector<32x128xf32>
    tpu.vector_store %arg13[%c8_116, %c0_117], %98 {strides = array<i32>} : memref<42x128xf32, #tpu.memory_space<vmem>>, vector<32x128xf32>,
    %c6_118 = arith.constant 6 : index
    %c0_119 = arith.constant 0 : index
    %100 = vector.load %arg13[%c6_118, %c0_119] : memref<42x128xf32, #tpu.memory_space<vmem>>, vector<32x128xf32>
    %101 = arith.truncf %100 : vector<32x128xf32> to vector<32x128xbf16>
    %c0_120 = arith.constant 0 : index
    %c0_121 = arith.constant 0 : index
    %102 = vector.load %arg15[%c0_120, %c0_121] : memref<32x640xbf16, #tpu.memory_space<vmem>>, vector<32x128xbf16>
    tpu.vector_store %arg15[%c0_120, %c0_121], %101 {strides = array<i32>} : memref<32x640xbf16, #tpu.memory_space<vmem>>, vector<32x128xbf16>,
    %c7_122 = arith.constant 7 : index
    %c0_123 = arith.constant 0 : index
    %103 = vector.load %arg13[%c7_122, %c0_123] : memref<42x128xf32, #tpu.memory_space<vmem>>, vector<32x128xf32>
    %104 = arith.truncf %103 : vector<32x128xf32> to vector<32x128xbf16>
    %c0_124 = arith.constant 0 : index
    %c128_125 = arith.constant 128 : index
    %105 = vector.load %arg15[%c0_124, %c128_125] : memref<32x640xbf16, #tpu.memory_space<vmem>>, vector<32x128xbf16>
    tpu.vector_store %arg15[%c0_124, %c128_125], %104 {strides = array<i32>} : memref<32x640xbf16, #tpu.memory_space<vmem>>, vector<32x128xbf16>,
    %c8_126 = arith.constant 8 : index
    %c0_127 = arith.constant 0 : index
    %106 = vector.load %arg13[%c8_126, %c0_127] : memref<42x128xf32, #tpu.memory_space<vmem>>, vector<32x128xf32>
    %107 = arith.truncf %106 : vector<32x128xf32> to vector<32x128xbf16>
    %c0_128 = arith.constant 0 : index
    %c256_129 = arith.constant 256 : index
    %108 = vector.load %arg15[%c0_128, %c256_129] : memref<32x640xbf16, #tpu.memory_space<vmem>>, vector<32x128xbf16>
    tpu.vector_store %arg15[%c0_128, %c256_129], %107 {strides = array<i32>} : memref<32x640xbf16, #tpu.memory_space<vmem>>, vector<32x128xbf16>,
    %c9_130 = arith.constant 9 : index
    %c0_131 = arith.constant 0 : index
    %109 = vector.load %arg13[%c9_130, %c0_131] : memref<42x128xf32, #tpu.memory_space<vmem>>, vector<32x128xf32>
    %110 = arith.truncf %109 : vector<32x128xf32> to vector<32x128xbf16>
    %c0_132 = arith.constant 0 : index
    %c384_133 = arith.constant 384 : index
    %111 = vector.load %arg15[%c0_132, %c384_133] : memref<32x640xbf16, #tpu.memory_space<vmem>>, vector<32x128xbf16>
    tpu.vector_store %arg15[%c0_132, %c384_133], %110 {strides = array<i32>} : memref<32x640xbf16, #tpu.memory_space<vmem>>, vector<32x128xbf16>,
    %c10_134 = arith.constant 10 : index
    %c0_135 = arith.constant 0 : index
    %112 = vector.load %arg13[%c10_134, %c0_135] : memref<42x128xf32, #tpu.memory_space<vmem>>, vector<32x128xf32>
    %113 = arith.truncf %112 : vector<32x128xf32> to vector<32x128xbf16>
    %c0_136 = arith.constant 0 : index
    %c512_137 = arith.constant 512 : index
    %114 = vector.load %arg15[%c0_136, %c512_137] : memref<32x640xbf16, #tpu.memory_space<vmem>>, vector<32x128xbf16>
    tpu.vector_store %arg15[%c0_136, %c512_137], %113 {strides = array<i32>} : memref<32x640xbf16, #tpu.memory_space<vmem>>, vector<32x128xbf16>,
    %c0_138 = arith.constant 0 : index
    %c0_139 = arith.constant 0 : index
    %115 = vector.load %arg15[%c0_138, %c0_139] : memref<32x640xbf16, #tpu.memory_space<vmem>>, vector<32x640xbf16>
    %c0_140 = arith.constant 0 : index
    %c0_141 = arith.constant 0 : index
    %116 = vector.load %arg6[%c0_140, %c0_141] : memref<640x128xbf16, #tpu.memory_space<vmem>>, vector<640x128xbf16>
    %cst_142 = arith.constant dense<0.000000e+00> : vector<32x128xf32>
    %117 = tpu.matmul %115, %116, %cst_142 {dimension_numbers = #tpu.dot_dimension_numbers<[1], [0], [0], [1], [0, 0, 1, 1], [], []>} : vector<32x640xbf16>, vector<640x128xbf16>, vector<32x128xf32> -> vector<32x128xf32>
    %c0_143 = arith.constant 0 : index
    %c0_144 = arith.constant 0 : index
    %c0_145 = arith.constant 0 : index
    %118 = vector.load %arg1[%c0_143, %c0_144, %c0_145] : memref<1x32x128xf32, #tpu.memory_space<vmem>>, vector<1x32x128xf32>
    %119 = vector.shape_cast %118 : vector<1x32x128xf32> to vector<32x128xf32>
    %c0_146 = arith.constant 0 : index
    %c0_147 = arith.constant 0 : index
    %120 = vector.load %arg11[%c0_146, %c0_147] : memref<1x128xf32, #tpu.memory_space<vmem>>, vector<1x128xf32>
    %121 = vector.broadcast %120 : vector<1x128xf32> to vector<32x128xf32>
    %122 = arith.addf %117, %121 : vector<32x128xf32>
    %123 = arith.addf %122, %119 : vector<32x128xf32>
    %c0_148 = arith.constant 0 : index
    %c0_149 = arith.constant 0 : index
    %c0_150 = arith.constant 0 : index
    %124 = vector.load %arg12[%c0_148, %c0_149, %c0_150] : memref<1x32x128xf32, #tpu.memory_space<vmem>>, vector<1x32x128xf32>
    %125 = vector.shape_cast %124 : vector<1x32x128xf32> to vector<32x128xf32>
    %126 = vector.shape_cast %123 : vector<32x128xf32> to vector<1x32x128xf32>
    tpu.vector_store %arg12[%c0_148, %c0_149, %c0_150], %126 {strides = array<i32>} : memref<1x32x128xf32, #tpu.memory_space<vmem>>, vector<1x32x128xf32>,
    return
  }
  func.func @transform_0(%arg0: i32) -> (i32, i32, i32) {
    %c0_i32 = arith.constant 0 : i32
    %c0_i32_0 = arith.constant 0 : i32
    %c0_i32_1 = arith.constant 0 : i32
    return %arg0, %c0_i32, %c0_i32_0 : i32, i32, i32
  }
  func.func @transform_1(%arg0: i32) -> (i32, i32) {
    %c0_i32 = arith.constant 0 : i32
    %c0_i32_0 = arith.constant 0 : i32
    %c0_i32_1 = arith.constant 0 : i32
    return %c0_i32, %c0_i32_0 : i32, i32
  }
  func.func @transform_2(%arg0: i32) -> (i32, i32) {
    %c0_i32 = arith.constant 0 : i32
    %c0_i32_0 = arith.constant 0 : i32
    %c0_i32_1 = arith.constant 0 : i32
    return %c0_i32, %c0_i32_0 : i32, i32
  }
  func.func @transform_3(%arg0: i32) -> (i32, i32) {
    %c0_i32 = arith.constant 0 : i32
    %c0_i32_0 = arith.constant 0 : i32
    %c0_i32_1 = arith.constant 0 : i32
    return %c0_i32, %c0_i32_0 : i32, i32
  }
  func.func @transform_4(%arg0: i32) -> (i32, i32) {
    %c0_i32 = arith.constant 0 : i32
    %c0_i32_0 = arith.constant 0 : i32
    %c0_i32_1 = arith.constant 0 : i32
    return %c0_i32, %c0_i32_0 : i32, i32
  }
  func.func @transform_5(%arg0: i32) -> (i32, i32) {
    %c0_i32 = arith.constant 0 : i32
    %c0_i32_0 = arith.constant 0 : i32
    %c0_i32_1 = arith.constant 0 : i32
    return %c0_i32, %c0_i32_0 : i32, i32
  }
  func.func @transform_6(%arg0: i32) -> (i32, i32) {
    %c0_i32 = arith.constant 0 : i32
    %c0_i32_0 = arith.constant 0 : i32
    %c0_i32_1 = arith.constant 0 : i32
    return %c0_i32, %c0_i32_0 : i32, i32
  }
  func.func @transform_7(%arg0: i32) -> (i32, i32) {
    %c0_i32 = arith.constant 0 : i32
    %c0_i32_0 = arith.constant 0 : i32
    %c0_i32_1 = arith.constant 0 : i32
    return %c0_i32, %c0_i32_0 : i32, i32
  }
  func.func @transform_8(%arg0: i32) -> (i32, i32) {
    %c0_i32 = arith.constant 0 : i32
    %c0_i32_0 = arith.constant 0 : i32
    %c0_i32_1 = arith.constant 0 : i32
    return %c0_i32, %c0_i32_0 : i32, i32
  }
  func.func @transform_9(%arg0: i32) -> (i32, i32) {
    %c0_i32 = arith.constant 0 : i32
    %c0_i32_0 = arith.constant 0 : i32
    %c0_i32_1 = arith.constant 0 : i32
    return %c0_i32, %c0_i32_0 : i32, i32
  }
  func.func @transform_10(%arg0: i32) -> (i32, i32) {
    %c0_i32 = arith.constant 0 : i32
    %c0_i32_0 = arith.constant 0 : i32
    %c0_i32_1 = arith.constant 0 : i32
    return %c0_i32, %c0_i32_0 : i32, i32
  }
  func.func @transform_11(%arg0: i32) -> (i32, i32, i32) {
    %c0_i32 = arith.constant 0 : i32
    %c0_i32_0 = arith.constant 0 : i32
    %c0_i32_1 = arith.constant 0 : i32
    return %arg0, %c0_i32, %c0_i32_0 : i32, i32, i32
  }
}

</mosaic_0001>

<bundles_post_ra>
// kernel: _lambda_.1
= control target key start
LH: loop header
LB: loop body
LE: loop exit
PB: predicated region body
PF: predicated region fallthrough
CT: control target
= control target key end

     0   :  { %16 = vsyncpa [#allocation6], 0  ;;  %s5570_s0 = inlined_call_operand.vmem [shape: f32[2,32,128], index: 0, kind: input, shape index: {}]   ;;  %s5571_s1 = inlined_call_operand.hbm [shape: bf16[640,128], index: 1, kind: input, shape index: {}]   ;;  %s5572_s2 = inlined_call_operand.hbm [shape: bf16[640,128], index: 2, kind: input, shape index: {}]   ;;  %s5573_s3 = inlined_call_operand.hbm [shape: bf16[640,128], index: 3, kind: input, shape index: {}]   ;;  %s5574_s4 = inlined_call_operand.hbm [shape: bf16[640,128], index: 4, kind: input, shape index: {}]   ;;  %s5575_s5 = inlined_call_operand.hbm [shape: bf16[640,128], index: 5, kind: input, shape index: {}]   ;;  %s5576_s6 = inlined_call_operand.vmem [shape: f32[1,128], index: 6, kind: input, shape index: {}]   ;;  %s5577_s7 = inlined_call_operand.vmem [shape: f32[1,128], index: 7, kind: input, shape index: {}]   ;;  %s5578_s8 = inlined_call_operand.vmem [shape: f32[1,128], index: 8, kind: input, shape index: {}]   ;;  %s5579_s9 = inlined_call_operand.vmem [shape: f32[1,128], index: 9, kind: input, shape index: {}]   ;;  %s5580_s10 = inlined_call_operand.vmem [shape: f32[1,128], index: 10, kind: input, shape index: {}]   ;;  %s5581_s11 = inlined_call_operand.vmem [shape: f32[2,32,128], index: 11, kind: output, shape index: {}]  }
   0x1   :  { %17 = vsyncpa [#allocation8], 0 }
   0x2   :  { %18 = vsyncpa [#allocation11], 0  ;;  %s5397_s17 = smov 0  }
   0x3 LB: > { %s5403_s18 = sadd.s32 4294967295, %s5327_s17   ;;  %p3914_p0 = scmp.ge.s32.totalorder %s5327_s17, 1  ;;  %s5327_s17 = sphi %s5397_s17, %s24_s17  }
   0x4   : > { %p291_p1 = scmp.lt.s32.totalorder %s5327_s17, 3  ;;  %p4856_p2 = scmp.eq.s32.totalorder %s5403_s18, 0 }
   0x5   : > { %s5329_s20 = smov [#allocation7]   ;;  %s5330_s22 = smov [#allocation10]  }
   0x6   : > { %p5408_p3 = pnand %p3914_p0, %p291_p1  ;;  %s316_s21 = sshll.u32 %s5329_s20, 4  ;;  %s317_s21 = int_to_ptr.vmem [resolvable:$true] %s316_s21 }
   0x7   : > { %s342_s23 = sshll.u32 %s5330_s22, 4  ;;  %s5331_s25 = smov [#allocation5]   ;;  %s5414_s23 = int_to_ptr.vmem [resolvable:$true] %s342_s23 }
   0x8   : > { %p4840_p4 = pneg %p5408_p3  ;;  %s303_s26 = sshll.u32 %s5331_s25, 4  ;;  %s5422_s26 = int_to_ptr.vmem [resolvable:$true] %s303_s26 }
   0x9   : > { %s5332_s27 = smov [#allocation9]   ;;  %s5190_s30 = scalar_lea.vmem %s317_s21, 5120 }
   0xa   : > { %p5418_p5 = pnand %p4856_p2, %p4840_p4  ;;  %s5424_s28 = sshll.u32 %s5332_s27, 4  ;;  %s330_s28 = int_to_ptr.vmem [resolvable:$true] %s5424_s28 }
   0xb   : > { %p5191_p7 = scmp.ne.s32.totalorder %s317_s21, %s5190_s30  ;;  %p5198_p10 = scmp.lt.s32.totalorder %s317_s21, %s317_s21 }
   0xc   : > { %p5428_p6 = pneg %p5418_p5  ;;  %p5199_p11 = scmp.lt.s32.totalorder %s5190_s30, %s5190_s30 }
   0xe   : > { %p5193_p8 = pnand %p5191_p7, %p5428_p6  ;;  %p5200_p12 = por %p5199_p11, %p5198_p10 }
  0x10   : > { %p5194_p9 = pneg %p5193_p8 }
  0x12   : > { %p5201_p13 = pnand %p5200_p12, %p5194_p9 }
  0x14   : > { %5204 = shalt.err (!%p5201_p13)
}
  0x15   : > { %s5333_s12 = smov 64   ;;  %s5334_s13 = smov 4  }
  0x16   : > { %4846 = dma.hbm_to_vmem [thread:$0]  (!%p5418_p5), %s5572_s2, 5120, %s317_s21, [#allocation8], %s5333_s12, %s5333_s12, %s5334_s13  }
  0x17   : > { %s5216_s16 = scalar_lea.vmem %s5414_s23, 5120  ;;  %p5224_p7 = scmp.lt.s32.totalorder %s5414_s23, %s5414_s23 }
  0x18   : > { %p5217_p0 = scmp.ne.s32.totalorder %s5414_s23, %s5216_s16  ;;  %p5225_p8 = scmp.lt.s32.totalorder %s5216_s16, %s5216_s16 }
  0x1a   : > { %p5219_p1 = pnand %p5217_p0, %p5428_p6  ;;  %p5226_p9 = por %p5225_p8, %p5224_p7 }
  0x1c   : > { %p5220_p4 = pneg %p5219_p1 }
  0x1e   : > { %p5227_p10 = pnand %p5226_p9, %p5220_p4 }
  0x20   : > { %5230 = shalt.err (!%p5227_p10)
}
  0x21   : > { %4852 = dma.hbm_to_vmem [thread:$0]  (!%p5418_p5), %s5574_s4, 5120, %s5414_s23, [#allocation11], %s5333_s12, %s5333_s12, %s5334_s13  }
  0x22   : > { %s5242_s21 = scalar_lea.vmem %s5422_s26, 5120  ;;  %p5250_p0 = scmp.lt.s32.totalorder %s5422_s26, %s5422_s26 }
  0x23   : > { %p5243_p11 = scmp.ne.s32.totalorder %s5422_s26, %s5242_s21  ;;  %p5251_p1 = scmp.lt.s32.totalorder %s5242_s21, %s5242_s21 }
  0x25   : > { %p5245_p12 = pnand %p5243_p11, %p5428_p6  ;;  %p5252_p4 = por %p5251_p1, %p5250_p0 }
  0x27   : > { %p5246_p13 = pneg %p5245_p12 }
  0x29   : > { %p5253_p7 = pnand %p5252_p4, %p5246_p13 }
  0x2b   : > { %5256 = shalt.err (!%p5253_p7)
}
  0x2c   : > { %4843 = dma.hbm_to_vmem [thread:$0]  (!%p5418_p5), %s5571_s1, 5120, %s5422_s26, [#allocation6], %s5333_s12, %s5333_s12, %s5334_s13  }
  0x2d   : > { %s5268_s23 = scalar_lea.vmem %s330_s28, 5120  ;;  %p5276_p11 = scmp.lt.s32.totalorder %s330_s28, %s330_s28 }
  0x2e   : > { %p5269_p8 = scmp.ne.s32.totalorder %s330_s28, %s5268_s23  ;;  %p5277_p12 = scmp.lt.s32.totalorder %s5268_s23, %s5268_s23 }
  0x30   : > { %p5271_p9 = pnand %p5269_p8, %p5428_p6  ;;  %p5278_p13 = por %p5277_p12, %p5276_p11 }
  0x32   : > { %p5272_p10 = pneg %p5271_p9 }
  0x34   : > { %p5279_p0 = pnand %p5278_p13, %p5272_p10 }
  0x36   : > { %5282 = shalt.err (!%p5279_p0)
}
  0x37   : > { %4849 = dma.hbm_to_vmem [thread:$0]  (!%p5418_p5), %s5573_s3, 5120, %s330_s28, [#allocation8], %s5333_s12, %s5333_s12, %s5334_s13  }
  0x38   : > { %s5335_s26 = smov [#allocation12]  }
  0x39   : > { %s355_s15 = sshll.u32 %s5335_s26, 4  ;;  %s356_s15 = int_to_ptr.vmem [resolvable:$true] %s355_s15 }
  0x3a   : > { %s5294_s16 = scalar_lea.vmem %s356_s15, 5120  ;;  %p5302_p8 = scmp.lt.s32.totalorder %s356_s15, %s356_s15 }
  0x3b   : > { %p5295_p1 = scmp.ne.s32.totalorder %s356_s15, %s5294_s16  ;;  %p5303_p9 = scmp.lt.s32.totalorder %s5294_s16, %s5294_s16 }
  0x3d   : > { %p5297_p4 = pnand %p5295_p1, %p5428_p6  ;;  %p5304_p10 = por %p5303_p9, %p5302_p8 }
  0x3f   : > { %p5298_p7 = pneg %p5297_p4 }
  0x41   : > { %p5305_p11 = pnand %p5304_p10, %p5298_p7 }
  0x43   : > { %5308 = shalt.err (!%p5305_p11)
}
  0x44   : > { %4855 = dma.hbm_to_vmem [thread:$0]  (!%p5418_p5), %s5575_s5, 5120, %s356_s15, [#allocation11], %s5333_s12, %s5333_s12, %s5334_s13  }
  0x45   : > { %394 = sbr.rel (%p5408_p3) target bundleno = 1423 (0x58f), region = 64 }
  0x4a   : > { %5314 = dma.done.wait (%p4856_p2), [#allocation6], 5120  }
  0x4b   : > { %5316 = vsyncadd (%p4856_p2), [#allocation6], 4294962176 }
  0x4c   : > { %5318 = dma.done.wait (%p4856_p2), [#allocation8], 10240  }
  0x4d   : > { %5320 = vsyncadd (%p4856_p2), [#allocation8], 4294957056 }
  0x4e   : > { %5322 = dma.done.wait (%p4856_p2), [#allocation11], 10240  }
  0x4f   : > { %5324 = vsyncadd (%p4856_p2), [#allocation11], 4294957056  ;;  %v5336_v0 = vmov 0.0   ;;  %v4882_v1 = vld [vmem:[#allocation5 + $0x78] sm:$0xff]   ;;  %v4886_v5 = vld [vmem:[#allocation5 + $0x70] sm:$0xff]   ;;  %p450_p2 = scmp.lt.s32.totalorder %s5403_s18, 1 }
  0x50   : > { %461 = vst [vmem:[#allocation2 + $0x6] sm:$0x3] %v5336_v0  ;;  %462 = vst [vmem:[#allocation2 + $0x28] sm:$0x3] %v5336_v0  ;;  %v4883_v2 = vld [vmem:[#allocation5 + $0x38] sm:$0xff]   ;;  %4390 = vmatprep.subr.bf16.mxu0 %v4882_v1  ;;  %v4887_v6 = vld [vmem:[#allocation5 + $0x30] sm:$0xff]  }
  0x51   : > { %463 = vst [vmem:[#allocation3 + $0x6] sm:$0x3] %v5336_v0  ;;  %464 = vst [vmem:[#allocation3 + $0x28] sm:$0x3] %v5336_v0  ;;  %v4884_v3 = vld [vmem:[#allocation5 + $0xf8] sm:$0xff]   ;;  %4391 = vmatpush3.bf16.msra.mxu0 %v4883_v2  ;;  %v4888_v7 = vld [vmem:[#allocation5 + $0xf0] sm:$0xff]  }
  0x52   : > { %v4885_v4 = vld [vmem:[#allocation5 + $0xb8] sm:$0xff]   ;;  %4418 = vmatprep.subr.bf16.mxu1 %v4884_v3  ;;  %4392 = vmatprep.subr.bf16.mxu0 %v4886_v5  ;;  %v4889_v8 = vld [vmem:[#allocation5 + $0xb0] sm:$0xff]   ;;  %v4890_v9 = vld [vmem:[#allocation5 + $0x68] sm:$0xff]   ;;  %s5586_s18 = smov (!%p450_p2, %s5403_s18), 1 }
  0x53   : > { %4419 = vmatpush3.bf16.msra.mxu1 %v4885_v4  ;;  %v4891_v10 = vld [vmem:[#allocation5 + $0x28] sm:$0xff]   ;;  %v4894_v13 = vld [vmem:[#allocation5 + $0x60] sm:$0xff]   ;;  %v4898_v17 = vld [vmem:[#allocation5 + $0x58] sm:$0xff]   ;;  %s4288_s19 = sshll.u32 %s5586_s18, 5 }
  0x54   : > { %4420 = vmatprep.subr.bf16.mxu1 %v4888_v7  ;;  %v4892_v11 = vld [vmem:[#allocation5 + $0xe8] sm:$0xff]   ;;  %v4895_v14 = vld [vmem:[#allocation5 + $0x20] sm:$0xff]   ;;  %v4899_v18 = vld [vmem:[#allocation5 + $0x18] sm:$0xff]   ;;  %s5517_s12 = scalar_lea.vmem %s5570_s0, %s4288_s19  ;;  %s459_s28 = scalar_lea.vmem %s5581_s11, %s4288_s19 }
  0x55   : > { %4393 = vmatpush3.bf16.msra.mxu0 %v4887_v6  ;;  %v4893_v12 = vld [vmem:[#allocation5 + $0xa8] sm:$0xff]   ;;  %v4896_v15 = vld [vmem:[#allocation5 + $0xe0] sm:$0xff]   ;;  %v4900_v19 = vld [vmem:[#allocation5 + $0xd8] sm:$0xff]  }
  0x56   : > { %4394 = vmatprep.subr.bf16.mxu0 %v4890_v9  ;;  %v4897_v16 = vld [vmem:[#allocation5 + $0xa0] sm:$0xff]   ;;  %v4901_v20 = vld [vmem:[#allocation5 + $0x98] sm:$0xff]   ;;  %v4902_v21 = vld [vmem:[#allocation5 + $0x50] sm:$0xff]  }
  0x57   : > { %4421 = vmatpush3.bf16.msra.mxu1 %v4889_v8  ;;  %v4903_v22 = vld [vmem:[#allocation5 + $0x10] sm:$0xff]   ;;  %v4906_v25 = vld [vmem:[#allocation5 + $0x48] sm:$0xff]   ;;  %v4910_v29 = vld [vmem:[#allocation5 + $0x40] sm:$0xff]  }
  0x58   : > { %4422 = vmatprep.subr.bf16.mxu1 %v4892_v11  ;;  %v4904_v23 = vld [vmem:[#allocation5 + $0xd0] sm:$0xff]   ;;  %v4907_v26 = vld [vmem:[#allocation5 + $0x8] sm:$0xff]   ;;  %v4911_v30 = vld [vmem:[#allocation5] sm:$0xff]  }
  0x59   : > { %4395 = vmatpush3.bf16.msra.mxu0 %v4891_v10  ;;  %v4905_v24 = vld [vmem:[#allocation5 + $0x90] sm:$0xff]   ;;  %v4908_v27 = vld [vmem:[#allocation5 + $0xc8] sm:$0xff]   ;;  %v4912_v31 = vld [vmem:[#allocation5 + $0xc0] sm:$0xff]  }
  0x5a   : > { %4396 = vmatprep.subr.bf16.mxu0 %v4894_v13  ;;  %v4909_v28 = vld [vmem:[#allocation5 + $0x88] sm:$0xff]   ;;  %v465_v32 = vld [vmem:[%s5517_s12] sm:$0xff]  ;;  %v466_v33 = vld [vmem:[%s5517_s12 + $0x8] sm:$0xff] }
  0x5b   : > { %4423 = vmatpush3.bf16.msra.mxu1 %v4893_v12  ;;  %469 = vst [vmem:[#allocation2 + $0x8] sm:$0xff] %v465_v32  ;;  %470 = vst [vmem:[#allocation2 + $0x10] sm:$0xff] %v466_v33  ;;  %v4915_v34 = vld [vmem:[#allocation5 + $0x80] sm:$0xff]   ;;  %v4298_v35 = vpack.c.bf16 %v465_v32, %v465_v32  ;;  %v4299_v36 = vpack.c.bf16 %v466_v33, %v466_v33  ;;  %v5521_v37 = vld [vmem:[#allocation5 + $0x138] sm:$0xff]  }
  0x5c   : > { %4424 = vmatprep.subr.bf16.mxu1 %v4896_v15  ;;  %v467_v38 = vld [vmem:[%s5517_s12 + $0x10] sm:$0xff]  ;;  %v468_v40 = vld [vmem:[%s5517_s12 + $0x18] sm:$0xff]  ;;  %v4921_v10 = vld [vmem:[#allocation5 + $0x130] sm:$0xff]  }
  0x5d   : > { %4397 = vmatpush3.bf16.msra.mxu0 %v4895_v14  ;;  %471 = vst [vmem:[#allocation2 + $0x18] sm:$0xff] %v467_v38  ;;  %541 = vst [vmem:[#allocation4 + $0x8] sm:$0xf] %v4298_v35  ;;  %v4300_v39 = vpack.c.bf16 %v467_v38, %v467_v38  ;;  %v4301_v44 = vpack.c.bf16 %v468_v40, %v468_v40  ;;  %v4922_v15 = vld [vmem:[#allocation5 + $0x128] sm:$0xff]   ;;  %v4941_v32 = vld [vmem:[#allocation7 + $0x30] sm:$0xff]  }
  0x5e   : > { %4398 = vmatprep.subr.bf16.mxu0 %v4898_v17  ;;  %542 = vst [vmem:[#allocation4 + $0x1c] sm:$0xf] %v4299_v36  ;;  %472 = vst [vmem:[#allocation2 + $0x20] sm:$0xff] %v468_v40  ;;  %v4942_v33 = vld [vmem:[#allocation7 + $0xf0] sm:$0xff]   ;;  %v4944_v35 = vld [vmem:[#allocation7 + $0x68] sm:$0xff]  }
  0x5f   : > { %4425 = vmatpush3.bf16.msra.mxu1 %v4897_v16  ;;  %543 = vst [vmem:[#allocation4 + $0x30] sm:$0xf] %v4300_v39  ;;  %544 = vst [vmem:[#allocation4 + $0x44] sm:$0xf] %v4301_v44  ;;  %v4945_v36 = vld [vmem:[#allocation7 + $0x28] sm:$0xff]   ;;  %v4948_v39 = vld [vmem:[#allocation7 + $0x60] sm:$0xff]  }
  0x60   : > { %4426 = vmatprep.subr.bf16.mxu1 %v4900_v19  ;;  %v4947_v38 = vld [vmem:[#allocation7 + $0xa8] sm:$0xff]   ;;  %v4949_v40 = vld [vmem:[#allocation7 + $0x20] sm:$0xff]   ;;  %v4953_v44 = vld [vmem:[#allocation7 + $0x18] sm:$0xff]  }
  0x61   : > { %4399 = vmatpush3.bf16.msra.mxu0 %v4899_v18  ;;  %v4923_v18 = vld [vmem:[#allocation5 + $0x120] sm:$0xff]  }
  0x62   : > { %4400 = vmatprep.subr.bf16.mxu0 %v4902_v21  ;;  %v473_v41 = vld [vmem:[#allocation2 + $0x6] sm:$0xff]  ;;  %v474_v42 = vld [vmem:[#allocation2 + $0xe] sm:$0xff] }
  0x63   : > { %4427 = vmatpush3.bf16.msra.mxu1 %v4901_v20  ;;  %v497_v43 = vld [vmem:[#allocation2 + $0x7] sm:$0xff]  ;;  %v4290_v45 = vpack.c.bf16 %v473_v41, %v473_v41  ;;  %v4291_v46 = vpack.c.bf16 %v474_v42, %v474_v42  ;;  %v498_v47 = vld [vmem:[#allocation2 + $0xf] sm:$0xff] }
  0x64   : > { %4428 = vmatprep.subr.bf16.mxu1 %v4904_v23  ;;  %v4294_v48 = vpack.c.bf16 %v497_v43, %v497_v43  ;;  %v545_v49 = vld [vmem:[#allocation2 + $0x9] sm:$0xff]  ;;  %v4295_v50 = vpack.c.bf16 %v498_v47, %v498_v47  ;;  %v546_v51 = vld [vmem:[#allocation2 + $0x11] sm:$0xff]  ;;  %v4931_v23 = vld [vmem:[#allocation5 + $0x110] sm:$0xff]  }
  0x65   : > { %4401 = vmatpush3.bf16.msra.mxu0 %v4903_v22  ;;  %v4302_v52 = vpack.c.bf16 %v545_v49, %v545_v49  ;;  %v475_v53 = vld [vmem:[#allocation2 + $0x16] sm:$0xff]  ;;  %493 = vst [vmem:[#allocation4] sm:$0xf] %v4290_v45  ;;  %494 = vst [vmem:[#allocation4 + $0x14] sm:$0xf] %v4291_v46  ;;  %v4303_v55 = vpack.c.bf16 %v546_v51, %v546_v51  ;;  %v569_v58 = vld [vmem:[#allocation2 + $0xa] sm:$0xff] }
  0x66   : > { %4402 = vmatprep.subr.bf16.mxu0 %v4906_v25  ;;  %v499_v54 = vld [vmem:[#allocation2 + $0x17] sm:$0xff]  ;;  %517 = vst [vmem:[#allocation4 + $0x4] sm:$0xf] %v4294_v48  ;;  %v4292_v56 = vpack.c.bf16 %v475_v53, %v475_v53  ;;  %518 = vst [vmem:[#allocation4 + $0x18] sm:$0xf] %v4295_v50  ;;  %v4306_v60 = vpack.c.bf16 %v569_v58, %v569_v58  ;;  %v500_v63 = vld [vmem:[#allocation2 + $0x1f] sm:$0xff] }
  0x67   : > { %4429 = vmatpush3.bf16.msra.mxu1 %v4905_v24  ;;  %v4296_v57 = vpack.c.bf16 %v499_v54, %v499_v54  ;;  %565 = vst [vmem:[#allocation4 + $0xc] sm:$0xf] %v4302_v52  ;;  %566 = vst [vmem:[#allocation4 + $0x20] sm:$0xf] %v4303_v55  ;;  %v570_v59 = vld [vmem:[#allocation2 + $0x12] sm:$0xff]  ;;  %v476_v62 = vld [vmem:[#allocation2 + $0x1e] sm:$0xff]  ;;  %v4297_v2 = vpack.c.bf16 %v500_v63, %v500_v63 }
  0x68   : > { %4430 = vmatprep.subr.bf16.mxu1 %v4908_v27  ;;  %495 = vst [vmem:[#allocation4 + $0x28] sm:$0xf] %v4292_v56  ;;  %v4307_v61 = vpack.c.bf16 %v570_v59, %v570_v59  ;;  %v547_v0 = vld [vmem:[#allocation2 + $0x19] sm:$0xff]  ;;  %v4293_v1 = vpack.c.bf16 %v476_v62, %v476_v62  ;;  %v548_v3 = vld [vmem:[#allocation2 + $0x21] sm:$0xff]  ;;  %589 = vst [vmem:[#allocation4 + $0x10] sm:$0xf] %v4306_v60 }
  0x69   : > { %4403 = vmatpush3.bf16.msra.mxu0 %v4907_v26  ;;  %519 = vst [vmem:[#allocation4 + $0x2c] sm:$0xf] %v4296_v57  ;;  %v4304_v4 = vpack.c.bf16 %v547_v0, %v547_v0  ;;  %v571_v5 = vld [vmem:[#allocation2 + $0x1a] sm:$0xff]  ;;  %v572_v6 = vld [vmem:[#allocation2 + $0x22] sm:$0xff]  ;;  %v4305_v7 = vpack.c.bf16 %v548_v3, %v548_v3  ;;  %520 = vst [vmem:[#allocation4 + $0x40] sm:$0xf] %v4297_v2 }
  0x6a   : > { %4404 = vmatprep.subr.bf16.mxu0 %v4910_v29  ;;  %590 = vst [vmem:[#allocation4 + $0x24] sm:$0xf] %v4307_v61  ;;  %v4308_v8 = vpack.c.bf16 %v571_v5, %v571_v5  ;;  %v4309_v9 = vpack.c.bf16 %v572_v6, %v572_v6  ;;  %496 = vst [vmem:[#allocation4 + $0x3c] sm:$0xf] %v4293_v1  ;;  %v4920_v14 = vld [vmem:[#allocation4 + $0x8] ss:$20 sps:$4 sm:$0xff]  }
  0x6b   : > { %4431 = vmatpush3.bf16.msra.mxu1 %v4909_v28  ;;  %567 = vst [vmem:[#allocation4 + $0x34] sm:$0xf] %v4304_v4  ;;  %568 = vst [vmem:[#allocation4 + $0x48] sm:$0xf] %v4305_v7  ;;  %v4930_v20 = vld [vmem:[#allocation4 + $0x30] ss:$20 sps:$4 sm:$0xff]  }
  0x6c   : > { %4432 = vmatprep.subr.bf16.mxu1 %v4912_v31  ;;  %v4916_v12 = vld [vmem:[#allocation4] ss:$20 sps:$4 sm:$0xff]   ;;  %591 = vst [vmem:[#allocation4 + $0x38] sm:$0xf] %v4308_v8  ;;  %592 = vst [vmem:[#allocation4 + $0x4c] sm:$0xf] %v4309_v9 }
  0x6d   : > { %4405 = vmatpush3.bf16.msra.mxu0 %v4911_v30  ;;  %v4913_v11 = vld [vmem:[#allocation4 + $0x4] ss:$20 sps:$4 sm:$0xff]   ;;  %v4924_v22 = vld [vmem:[#allocation5 + $0x118] sm:$0xff]   ;;  %v4933_v25 = vld [vmem:[#allocation5 + $0x100] sm:$0xff]  }
  0x6e   : > { %4720 = vmatprep.subr.bf16.mxu0 %v5521_v37  ;;  %v4918_v13 = vld [vmem:[#allocation4 + $0xc] ss:$20 sps:$4 sm:$0xff]   ;;  %1016 = vmatprep.mubr.bf16.mxu0 %v4913_v11  ;;  %v4932_v24 = vld [vmem:[#allocation5 + $0x108] sm:$0xff]   ;;  %v4950_v41 = vld [vmem:[#allocation7 + $0xe0] sm:$0xff]  }
  0x6f   : > { %4433 = vmatpush3.bf16.msra.mxu1 %v4915_v34  ;;  %1065 = vmatprep.mubr.bf16.mxu1 %v4918_v13  ;;  %v4936_v27 = vld [vmem:[#allocation7 + $0x78] sm:$0xff]   ;;  %v4940_v31 = vld [vmem:[#allocation7 + $0x70] sm:$0xff]   ;;  %v4951_v42 = vld [vmem:[#allocation7 + $0xa0] sm:$0xff]  }
  0x70   : > { %1017 = vmatmul.mubr.bf16.vlgmr.msra.gmra.mxu0 %v4916_v12  ;;  %v4925_v16 = vld [vmem:[#allocation4 + $0x2c] ss:$20 sps:$4 sm:$0xff]   ;;  %4456 = vmatprep.subr.bf16.mxu1 %v4936_v27  ;;  %v4960_v51 = vld [vmem:[#allocation7 + $0x48] sm:$0xff]   ;;  %v4964_v55 = vld [vmem:[#allocation7 + $0x40] sm:$0xff]  }
  0x71   : > { %4721 = vmatpush3.bf16.msra.mxu0 %v5521_v37  ;;  %v4927_v17 = vld [vmem:[#allocation4 + $0x28] ss:$20 sps:$4 sm:$0xff]   ;;  %1024 = vmatprep.mubr.bf16.mxu0 %v4925_v16  ;;  %v4934_v21 = vld [vmem:[#allocation4 + $0x10] ss:$20 sps:$4 sm:$0xff]   ;;  %v3951_v13 = vld [vmem:[%s5576_s6] ss:$0 sm:$0xff] }
  0x72   : > { %1066 = vmatmul.mubr.bf16.vlgmr.msra.gmra.mxu1 %v4920_v14  ;;  %4722 = vmatprep.subr.bf16.mxu0 %v4921_v10  ;;  %v4928_v19 = vld [vmem:[#allocation4 + $0x34] ss:$20 sps:$4 sm:$0xff]   ;;  %v4943_v34 = vld [vmem:[#allocation7 + $0xb0] sm:$0xff]   ;;  %v4946_v37 = vld [vmem:[#allocation7 + $0xe8] sm:$0xff]  }
  0x73   : > { %1073 = vmatprep.mubr.bf16.mxu1 %v4928_v19  ;;  %v4935_v26 = vld [vmem:[#allocation4 + $0x38] ss:$20 sps:$4 sm:$0xff]   ;;  %v4956_v47 = vld [vmem:[#allocation7 + $0x50] sm:$0xff]   ;;  %v4966_v56 = vld [vmem:[#allocation7 + $0xc0] sm:$0xff]  }
  0x74   : > { %v4937_v28 = vld [vmem:[#allocation7 + $0x38] sm:$0xff]   ;;  %v4957_v48 = vld [vmem:[#allocation7 + $0x10] sm:$0xff]   ;;  %v4961_v52 = vld [vmem:[#allocation7 + $0x8] sm:$0xff]  }
  0x75   : > { %4723 = vmatpush3.bf16.msra.mxu0 %v4921_v10  ;;  %v4938_v29 = vld [vmem:[#allocation7 + $0xf8] sm:$0xff]   ;;  %4457 = vmatpush3.bf16.msra.mxu1 %v4937_v28  ;;  %v4958_v49 = vld [vmem:[#allocation7 + $0xd0] sm:$0xff]   ;;  %v4962_v53 = vld [vmem:[#allocation7 + $0xc8] sm:$0xff]  }
  0x76   : > { %4724 = vmatprep.subr.bf16.mxu0 %v4922_v15  ;;  %v4939_v30 = vld [vmem:[#allocation7 + $0xb8] sm:$0xff]   ;;  %4458 = vmatprep.subr.bf16.mxu1 %v4940_v31  ;;  %v4959_v50 = vld [vmem:[#allocation7 + $0x90] sm:$0xff]   ;;  %v4963_v54 = vld [vmem:[#allocation7 + $0x88] sm:$0xff]  }
  0x77   : > { %v4952_v43 = vld [vmem:[#allocation7 + $0x58] sm:$0xff]   ;;  %v4965_v57 = vld [vmem:[#allocation7] sm:$0xff]  }
  0x78   : > { %1025 = vmatmul.mubr.bf16.gmra.mxu0 %v4927_v17  ;;  %v4954_v45 = vld [vmem:[#allocation7 + $0xd8] sm:$0xff]   ;;  %v4967_v58 = vld [vmem:[#allocation7 + $0x80] sm:$0xff]  }
  0x79   : > { %4725 = vmatpush3.bf16.msra.mxu0 %v4922_v15  ;;  %4736 = vmatprep.mubr.bf16.mxu0 %v4934_v21  ;;  %v4955_v46 = vld [vmem:[#allocation7 + $0x98] sm:$0xff]  }
  0x7a   : > { %1074 = vmatmul.mubr.bf16.gmra.mxu1 %v4930_v20  ;;  %4726 = vmatprep.subr.bf16.mxu0 %v4923_v18  ;;  %v5527_v59 = vld [vmem:[#allocation7 + $0x138] sm:$0xff]  }
  0x7b   : > { %4459 = vmatpush3.bf16.msra.mxu1 %v4941_v32 }
  0x7c   : > { %4460 = vmatprep.subr.bf16.mxu1 %v4944_v35 }
  0x7d   : > { %4727 = vmatpush3.bf16.msra.mxu0 %v4923_v18 }
  0x7e   : > { %4728 = vmatprep.subr.bf16.mxu0 %v4924_v22 }
  0x7f   : > { %4461 = vmatpush3.bf16.msra.mxu1 %v4945_v36 }
  0x80   : > { %4462 = vmatprep.subr.bf16.mxu1 %v4948_v39 }
  0x81   : > { %4729 = vmatpush3.bf16.msra.mxu0 %v4924_v22 }
  0x82   : > { %4730 = vmatprep.subr.bf16.mxu0 %v4931_v23 }
  0x83   : > { %4463 = vmatpush3.bf16.msra.mxu1 %v4949_v40 }
  0x84   : > { %4464 = vmatprep.subr.bf16.mxu1 %v4952_v43 }
  0x85   : > { %4731 = vmatpush3.bf16.msra.mxu0 %v4931_v23 }
  0x86   : > { %4732 = vmatprep.subr.bf16.mxu0 %v4932_v24 }
  0x87   : > { %4465 = vmatpush3.bf16.msra.mxu1 %v4953_v44 }
  0x88   : > { %4466 = vmatprep.subr.bf16.mxu1 %v4956_v47 }
  0x89   : > { %4733 = vmatpush3.bf16.msra.mxu0 %v4932_v24 }
  0x8a   : > { %4734 = vmatprep.subr.bf16.mxu0 %v4933_v25 }
  0x8b   : > { %4467 = vmatpush3.bf16.msra.mxu1 %v4957_v48 }
  0x8c   : > { %4468 = vmatprep.subr.bf16.mxu1 %v4960_v51 }
  0x8d   : > { %4735 = vmatpush3.bf16.msra.mxu0 %v4933_v25 }
  0x8e   : > { %4484 = vmatprep.subr.bf16.mxu0 %v4938_v29 }
  0x8f   : > { %4469 = vmatpush3.bf16.msra.mxu1 %v4961_v52 }
  0x90   : > { %4737 = vmatmul.mubr.bf16.vlgmr.msra.gmra.mxu0 %v4935_v26  ;;  %4470 = vmatprep.subr.bf16.mxu1 %v4964_v55 }
  0x91   : > { %4485 = vmatpush3.bf16.msra.mxu0 %v4939_v30 }
  0x92   : > { %4486 = vmatprep.subr.bf16.mxu0 %v4942_v33 }
  0x93   : > { %4471 = vmatpush3.bf16.msra.mxu1 %v4965_v57 }
  0x94   : > { %4740 = vmatprep.subr.bf16.mxu1 %v5527_v59 }
  0x95   : > { %4487 = vmatpush3.bf16.msra.mxu0 %v4943_v34 }
  0x96   : > { %4488 = vmatprep.subr.bf16.mxu0 %v4946_v37 }
  0x99   : > { %4489 = vmatpush3.bf16.msra.mxu0 %v4947_v38 }
  0x9a   : > { %4490 = vmatprep.subr.bf16.mxu0 %v4950_v41 }
  0x9d   : > { %4491 = vmatpush3.bf16.msra.mxu0 %v4951_v42 }
  0x9e   : > { %4492 = vmatprep.subr.bf16.mxu0 %v4954_v45 }
  0xa1   : > { %4493 = vmatpush3.bf16.msra.mxu0 %v4955_v46 }
  0xa2   : > { %4494 = vmatprep.subr.bf16.mxu0 %v4958_v49 }
  0xa5   : > { %4495 = vmatpush3.bf16.msra.mxu0 %v4959_v50 }
  0xa6   : > { %4496 = vmatprep.subr.bf16.mxu0 %v4962_v53 }
  0xa9   : > { %4497 = vmatpush3.bf16.msra.mxu0 %v4963_v54 }
  0xaa   : > { %4498 = vmatprep.subr.bf16.mxu0 %v4966_v56 }
  0xad   : > { %4499 = vmatpush3.bf16.msra.mxu0 %v4967_v58 }
 0x130   : > { %v4406_v60 = vpop.f32.mrf.mxu0 }
 0x132   : > { %v4407_v61 = vpop.f32.mrf.mxu0  ;;  %v4434_v62 = vpop.f32.mrf.mxu1 }
 0x133   : > { %v4408_v12 = vadd.f32 %v4407_v61, %v4406_v60 }
 0x134   : > { %v4409_v63 = vpop.f32.mrf.mxu0  ;;  %v4435_v0 = vpop.f32.mrf.mxu1 }
 0x135   : > { %v1019_v18 = vadd.f32 %v4408_v12, %v3951_v13  ;;  %v4436_v19 = vadd.f32 %v4435_v0, %v4434_v62 }
 0x136   : > { %v4410_v1 = vpop.f32.mrf.mxu0  ;;  %v4437_v2 = vpop.f32.mrf.mxu1 }
 0x137   : > { %v4411_v20 = vadd.f32 %v4410_v1, %v4409_v63  ;;  %v1068_v28 = vadd.f32 %v4436_v19, %v1019_v18 }
 0x138   : > { %v4412_v3 = vpop.f32.mrf.mxu0  ;;  %v4438_v4 = vpop.f32.mrf.mxu1 }
 0x139   : > { %v1022_v25 = vadd.f32 %v4411_v20, %v3951_v13  ;;  %v4439_v26 = vadd.f32 %v4438_v4, %v4437_v2 }
 0x13a   : > { %v4413_v5 = vpop.f32.mrf.mxu0  ;;  %v4440_v6 = vpop.f32.mrf.mxu1 }
 0x13b   : > { %v4414_v9 = vadd.f32 %v4413_v5, %v4412_v3  ;;  %v1071_v34 = vadd.f32 %v4439_v26, %v1022_v25  ;;  %v4985_v26 = vld [vmem:[#allocation7 + $0x118] sm:$0xff]  }
 0x13c   : > { %v4415_v7 = vpop.f32.mrf.mxu0  ;;  %v4441_v8 = vpop.f32.mrf.mxu1 }
 0x13d   : > { %v1027_v14 = vadd.f32 %v4414_v9, %v3951_v13  ;;  %v4442_v15 = vadd.f32 %v4441_v8, %v4440_v6 }
 0x13e   : > { %v4416_v10 = vpop.f32.mrf.mxu0  ;;  %v4443_v11 = vpop.f32.mrf.mxu1 }
 0x13f   : > { %v4417_v16 = vadd.f32 %v4416_v10, %v4415_v7  ;;  %v1076_v23 = vadd.f32 %v4442_v15, %v1027_v14 }
 0x140   : > { %v4444_v17 = vpop.f32.mrf.mxu1 }
 0x141   : > { %v1030_v21 = vadd.f32 %v4417_v16, %v3951_v13  ;;  %v4445_v22 = vadd.f32 %v4444_v17, %v4443_v11  ;;  %v4979_v16 = vld [vmem:[#allocation7 + $0x130] sm:$0xff]  }
 0x143   : > { %v1079_v31 = vadd.f32 %v4445_v22, %v1030_v21  ;;  %v4980_v21 = vld [vmem:[#allocation7 + $0x128] sm:$0xff]  }
 0x150   : > { %v4738_v24 = vpop.f32.mrf.mxu0 }
 0x151   : > { %v1125_v27 = vadd.f32 %v4738_v24, %v1076_v23  ;;  %v4984_v23 = vld [vmem:[#allocation7 + $0x120] sm:$0xff]  }
 0x152   : > { %v1116_v29 = vpop.f32.mrf.mxu0 }
 0x153   : > { %5147 = vtanh.f32 %v1125_v27  ;;  %v1117_v30 = vadd.f32 %v1116_v29, %v1068_v28  ;;  %v4986_v27 = vld [vmem:[#allocation7 + $0x110] sm:$0xff]   ;;  %v4988_v28 = vld [vmem:[#allocation7 + $0x100] sm:$0xff]  }
 0x154   : > { %v4739_v32 = vpop.f32.mrf.mxu0 }
 0x155   : > { %5149 = vtanh.f32 %v1117_v30  ;;  %v1128_v33 = vadd.f32 %v4739_v32, %v1079_v31  ;;  %v4990_v30 = vld [vmem:[#allocation9 + $0x78] sm:$0xff]  }
 0x156   : > { %v1119_v35 = vpop.f32.mrf.mxu0  ;;  %v4991_v31 = vld [vmem:[#allocation9 + $0x38] sm:$0xff]   ;;  %4522 = vmatprep.subr.bf16.mxu0 %v4990_v30 }
 0x157   : > { %5151 = vtanh.f32 %v1128_v33  ;;  %v1120_v36 = vadd.f32 %v1119_v35, %v1071_v34  ;;  %v4992_v32 = vld [vmem:[#allocation9 + $0xf8] sm:$0xff]   ;;  %v4994_v34 = vld [vmem:[#allocation9 + $0x70] sm:$0xff]  }
 0x158   : > { %v4993_v33 = vld [vmem:[#allocation9 + $0xb8] sm:$0xff]   ;;  %v4995_v35 = vld [vmem:[#allocation9 + $0x30] sm:$0xff]  }
 0x159   : > { %5153 = vtanh.f32 %v1120_v36  ;;  %v4996_v36 = vld [vmem:[#allocation9 + $0xf0] sm:$0xff]  }
 0x160   : > { %v5148_v37 = vpop.eup %5147 }
 0x161   : > { %1137 = vst [vmem:[#allocation3 + $0x18] sm:$0xff] %v5148_v37  ;;  %v4320_v38 = vpack.c.bf16 %v5148_v37, %v5148_v37  ;;  %v4997_v37 = vld [vmem:[#allocation9 + $0xb0] sm:$0xff]  }
 0x162   : > { %v5150_v39 = vpop.eup %5149 }
 0x163   : > { %1209 = vst [vmem:[#allocation4 + $0x30] sm:$0xf] %v4320_v38  ;;  %1135 = vst [vmem:[#allocation3 + $0x8] sm:$0xff] %v5150_v39  ;;  %v4318_v40 = vpack.c.bf16 %v5150_v39, %v5150_v39  ;;  %v4998_v38 = vld [vmem:[#allocation9 + $0x68] sm:$0xff]  }
 0x164   : > { %v5152_v41 = vpop.eup %5151  ;;  %v4999_v39 = vld [vmem:[#allocation9 + $0x28] sm:$0xff]  }
 0x165   : > { %1207 = vst [vmem:[#allocation4 + $0x8] sm:$0xf] %v4318_v40  ;;  %1138 = vst [vmem:[#allocation3 + $0x20] sm:$0xff] %v5152_v41  ;;  %v4321_v42 = vpack.c.bf16 %v5152_v41, %v5152_v41  ;;  %v5000_v40 = vld [vmem:[#allocation9 + $0xe8] sm:$0xff]  }
 0x166   : > { %v5154_v43 = vpop.eup %5153  ;;  %v5001_v41 = vld [vmem:[#allocation9 + $0xa8] sm:$0xff]  }
 0x167   : > { %1210 = vst [vmem:[#allocation4 + $0x44] sm:$0xf] %v4321_v42  ;;  %1136 = vst [vmem:[#allocation3 + $0x10] sm:$0xff] %v5154_v43  ;;  %v4319_v44 = vpack.c.bf16 %v5154_v43, %v5154_v43  ;;  %v5002_v42 = vld [vmem:[#allocation9 + $0x60] sm:$0xff]  }
 0x168   : > { %v5004_v43 = vld [vmem:[#allocation9 + $0xe0] sm:$0xff]  }
 0x169   : > { %1208 = vst [vmem:[#allocation4 + $0x1c] sm:$0xf] %v4319_v44  ;;  %v5003_v44 = vld [vmem:[#allocation9 + $0x20] sm:$0xff]  }
 0x16a   : > { %v1139_v45 = vld [vmem:[#allocation3 + $0x6] sm:$0xff] }
 0x16b   : > { %v1163_v46 = vld [vmem:[#allocation3 + $0x7] sm:$0xff]  ;;  %v4310_v47 = vpack.c.bf16 %v1139_v45, %v1139_v45 }
 0x16c   : > { %v4314_v48 = vpack.c.bf16 %v1163_v46, %v1163_v46  ;;  %v1142_v49 = vld [vmem:[#allocation3 + $0x1e] sm:$0xff] }
 0x16d   : > { %v1166_v50 = vld [vmem:[#allocation3 + $0x1f] sm:$0xff]  ;;  %1159 = vst [vmem:[#allocation4] sm:$0xf] %v4310_v47  ;;  %v4313_v52 = vpack.c.bf16 %v1142_v49, %v1142_v49 }
 0x16e   : > { %v1213_v51 = vld [vmem:[#allocation3 + $0x19] sm:$0xff]  ;;  %1183 = vst [vmem:[#allocation4 + $0x4] sm:$0xf] %v4314_v48  ;;  %v4317_v53 = vpack.c.bf16 %v1166_v50, %v1166_v50  ;;  %v1214_v54 = vld [vmem:[#allocation3 + $0x21] sm:$0xff]  ;;  %v1140_v62 = vld [vmem:[#allocation3 + $0xe] sm:$0xff] }
 0x16f   : > { %v4324_v55 = vpack.c.bf16 %v1213_v51, %v1213_v51  ;;  %v1237_v56 = vld [vmem:[#allocation3 + $0x1a] sm:$0xff]  ;;  %v1238_v57 = vld [vmem:[#allocation3 + $0x22] sm:$0xff]  ;;  %v4325_v58 = vpack.c.bf16 %v1214_v54, %v1214_v54  ;;  %v1164_v0 = vld [vmem:[#allocation3 + $0xf] sm:$0xff]  ;;  %1162 = vst [vmem:[#allocation4 + $0x3c] sm:$0xf] %v4313_v52  ;;  %v4311_v1 = vpack.c.bf16 %v1140_v62, %v1140_v62 }
 0x170   : > { %v4328_v60 = vpack.c.bf16 %v1237_v56, %v1237_v56  ;;  %v4329_v61 = vpack.c.bf16 %v1238_v57, %v1238_v57  ;;  %v1141_v63 = vld [vmem:[#allocation3 + $0x16] sm:$0xff]  ;;  %1186 = vst [vmem:[#allocation4 + $0x40] sm:$0xf] %v4317_v53  ;;  %v4315_v4 = vpack.c.bf16 %v1164_v0, %v1164_v0  ;;  %v1211_v5 = vld [vmem:[#allocation3 + $0x9] sm:$0xff]  ;;  %v5005_v45 = vld [vmem:[#allocation9 + $0xa0] sm:$0xff]  }
 0x171   : > { %1233 = vst [vmem:[#allocation4 + $0x34] sm:$0xf] %v4324_v55  ;;  %v4312_v2 = vpack.c.bf16 %v1141_v63, %v1141_v63  ;;  %v1165_v3 = vld [vmem:[#allocation3 + $0x17] sm:$0xff]  ;;  %1234 = vst [vmem:[#allocation4 + $0x48] sm:$0xf] %v4325_v58  ;;  %v4322_v8 = vpack.c.bf16 %v1211_v5, %v1211_v5  ;;  %v1235_v10 = vld [vmem:[#allocation3 + $0xa] sm:$0xff] }
 0x172   : > { %v1212_v6 = vld [vmem:[#allocation3 + $0x11] sm:$0xff]  ;;  %1257 = vst [vmem:[#allocation4 + $0x38] sm:$0xf] %v4328_v60  ;;  %1258 = vst [vmem:[#allocation4 + $0x4c] sm:$0xf] %v4329_v61  ;;  %v4316_v7 = vpack.c.bf16 %v1165_v3, %v1165_v3  ;;  %v4326_v12 = vpack.c.bf16 %v1235_v10, %v1235_v10  ;;  %v5014_v54 = vld [vmem:[#allocation9 + $0x48] sm:$0xff]  }
 0x173   : > { %v4323_v9 = vpack.c.bf16 %v1212_v6, %v1212_v6  ;;  %v1236_v11 = vld [vmem:[#allocation3 + $0x12] sm:$0xff]  ;;  %1160 = vst [vmem:[#allocation4 + $0x14] sm:$0xf] %v4311_v1  ;;  %1161 = vst [vmem:[#allocation4 + $0x28] sm:$0xf] %v4312_v2  ;;  %v5016_v55 = vld [vmem:[#allocation9 + $0xc8] sm:$0xff]  }
 0x174   : > { %1184 = vst [vmem:[#allocation4 + $0x18] sm:$0xf] %v4315_v4  ;;  %v4327_v13 = vpack.c.bf16 %v1236_v11, %v1236_v11  ;;  %1185 = vst [vmem:[#allocation4 + $0x2c] sm:$0xf] %v4316_v7  ;;  %v4974_v18 = vld [vmem:[#allocation4 + $0x8] ss:$20 sps:$4 sm:$0xff]  }
 0x175   : > { %1231 = vst [vmem:[#allocation4 + $0xc] sm:$0xf] %v4322_v8  ;;  %1232 = vst [vmem:[#allocation4 + $0x20] sm:$0xf] %v4323_v9  ;;  %v4982_v24 = vld [vmem:[#allocation4 + $0x30] ss:$20 sps:$4 sm:$0xff]  }
 0x176   : > { %1255 = vst [vmem:[#allocation4 + $0x10] sm:$0xf] %v4326_v12  ;;  %1256 = vst [vmem:[#allocation4 + $0x24] sm:$0xf] %v4327_v13  ;;  %v5006_v46 = vld [vmem:[#allocation9 + $0x58] sm:$0xff]   ;;  %v5010_v50 = vld [vmem:[#allocation9 + $0x50] sm:$0xff]  }
 0x177   : > { %v5008_v47 = vld [vmem:[#allocation9 + $0xd8] sm:$0xff]   ;;  %v5012_v51 = vld [vmem:[#allocation9 + $0xd0] sm:$0xff]   ;;  %v5015_v56 = vld [vmem:[#allocation9 + $0x8] sm:$0xff]  }
 0x178   : > { %v4977_v19 = vld [vmem:[#allocation4 + $0x34] ss:$20 sps:$4 sm:$0xff]   ;;  %v5011_v52 = vld [vmem:[#allocation9 + $0x10] sm:$0xff]   ;;  %v5017_v57 = vld [vmem:[#allocation9 + $0x88] sm:$0xff]  }
 0x179   : > { %v4989_v29 = vld [vmem:[#allocation4 + $0x38] ss:$20 sps:$4 sm:$0xff]   ;;  %v5013_v53 = vld [vmem:[#allocation9 + $0x90] sm:$0xff]   ;;  %v5018_v58 = vld [vmem:[#allocation9 + $0x40] sm:$0xff]  }
 0x17a   : > { %v4973_v15 = vld [vmem:[#allocation4] ss:$20 sps:$4 sm:$0xff]   ;;  %v4981_v22 = vld [vmem:[#allocation4 + $0x28] ss:$20 sps:$4 sm:$0xff]  }
 0x17b   : > { %v4968_v14 = vld [vmem:[#allocation4 + $0x4] ss:$20 sps:$4 sm:$0xff]   ;;  %v4975_v20 = vld [vmem:[#allocation4 + $0x2c] ss:$20 sps:$4 sm:$0xff]   ;;  %v5020_v60 = vld [vmem:[#allocation9 + $0xc0] sm:$0xff]  }
 0x17c   : > { %v4970_v17 = vld [vmem:[#allocation4 + $0xc] ss:$20 sps:$4 sm:$0xff]   ;;  %1682 = vmatprep.mubr.bf16.mxu1 %v4968_v14  ;;  %v5019_v61 = vld [vmem:[#allocation9] sm:$0xff]  }
 0x17d   : > { %1731 = vmatprep.mubr.bf16.mxu0 %v4970_v17  ;;  %1683 = vmatmul.mubr.bf16.vlgmr.msra.gmra.mxu1 %v4973_v15  ;;  %v4983_v25 = vld [vmem:[#allocation4 + $0x10] ss:$20 sps:$4 sm:$0xff]   ;;  %v5007_v48 = vld [vmem:[#allocation9 + $0x18] sm:$0xff]  }
 0x17e   : > { %1732 = vmatmul.mubr.bf16.vlgmr.msra.gmra.mxu0 %v4974_v18  ;;  %4741 = vmatpush3.bf16.msra.mxu1 %v5527_v59  ;;  %v4987_v59 = vld [vmem:[#allocation7 + $0x108] sm:$0xff]   ;;  %v5009_v49 = vld [vmem:[#allocation9 + $0x98] sm:$0xff]   ;;  %v5021_v62 = vld [vmem:[#allocation9 + $0x80] sm:$0xff]  }
 0x17f   : > { %1690 = vmatprep.mubr.bf16.mxu1 %v4975_v20  ;;  %1739 = vmatprep.mubr.bf16.mxu0 %v4977_v19  ;;  %v5534_v63 = vld [vmem:[#allocation9 + $0x138] sm:$0xff]  }
 0x180   : > { %4742 = vmatprep.subr.bf16.mxu1 %v4979_v16  ;;  %4523 = vmatpush3.bf16.msra.mxu0 %v4991_v31 }
 0x181   : > { %4524 = vmatprep.subr.bf16.mxu0 %v4994_v34 }
 0x182   : > { %4743 = vmatpush3.bf16.msra.mxu1 %v4979_v16  ;;  %v4022_v16 = vld [vmem:[%s5577_s7] ss:$0 sm:$0xff] }
 0x183   : > { %4744 = vmatprep.subr.bf16.mxu1 %v4980_v21 }
 0x184   : > { %4525 = vmatpush3.bf16.msra.mxu0 %v4995_v35 }
 0x185   : > { %1691 = vmatmul.mubr.bf16.gmra.mxu1 %v4981_v22  ;;  %4526 = vmatprep.subr.bf16.mxu0 %v4998_v38 }
 0x186   : > { %1740 = vmatmul.mubr.bf16.gmra.mxu0 %v4982_v24  ;;  %4745 = vmatpush3.bf16.msra.mxu1 %v4980_v21 }
 0x187   : > { %4756 = vmatprep.mubr.bf16.mxu1 %v4983_v25  ;;  %4746 = vmatprep.subr.bf16.mxu1 %v4984_v23 }
 0x188   : > { %4527 = vmatpush3.bf16.msra.mxu0 %v4999_v39 }
 0x189   : > { %4528 = vmatprep.subr.bf16.mxu0 %v5002_v42 }
 0x18a   : > { %4747 = vmatpush3.bf16.msra.mxu1 %v4984_v23 }
 0x18b   : > { %4748 = vmatprep.subr.bf16.mxu1 %v4985_v26 }
 0x18c   : > { %4529 = vmatpush3.bf16.msra.mxu0 %v5003_v44 }
 0x18d   : > { %4530 = vmatprep.subr.bf16.mxu0 %v5006_v46 }
 0x18e   : > { %4749 = vmatpush3.bf16.msra.mxu1 %v4985_v26 }
 0x18f   : > { %4750 = vmatprep.subr.bf16.mxu1 %v4986_v27 }
 0x190   : > { %4531 = vmatpush3.bf16.msra.mxu0 %v5007_v48 }
 0x191   : > { %4532 = vmatprep.subr.bf16.mxu0 %v5010_v50 }
 0x192   : > { %4751 = vmatpush3.bf16.msra.mxu1 %v4986_v27 }
 0x193   : > { %4752 = vmatprep.subr.bf16.mxu1 %v4987_v59 }
 0x194   : > { %4533 = vmatpush3.bf16.msra.mxu0 %v5011_v52 }
 0x195   : > { %4534 = vmatprep.subr.bf16.mxu0 %v5014_v54 }
 0x196   : > { %4753 = vmatpush3.bf16.msra.mxu1 %v4987_v59 }
 0x197   : > { %4754 = vmatprep.subr.bf16.mxu1 %v4988_v28 }
 0x198   : > { %4535 = vmatpush3.bf16.msra.mxu0 %v5015_v56 }
 0x199   : > { %4536 = vmatprep.subr.bf16.mxu0 %v5018_v58 }
 0x19a   : > { %4755 = vmatpush3.bf16.msra.mxu1 %v4988_v28 }
 0x19b   : > { %4550 = vmatprep.subr.bf16.mxu1 %v4992_v32 }
 0x19c   : > { %4537 = vmatpush3.bf16.msra.mxu0 %v5019_v61 }
 0x19d   : > { %4757 = vmatmul.mubr.bf16.vlgmr.msra.gmra.mxu1 %v4989_v29  ;;  %4760 = vmatprep.subr.bf16.mxu0 %v5534_v63 }
 0x19e   : > { %4551 = vmatpush3.bf16.msra.mxu1 %v4993_v33 }
 0x19f   : > { %4552 = vmatprep.subr.bf16.mxu1 %v4996_v36 }
 0x1a2   : > { %4553 = vmatpush3.bf16.msra.mxu1 %v4997_v37 }
 0x1a3   : > { %4554 = vmatprep.subr.bf16.mxu1 %v5000_v40 }
 0x1a6   : > { %4555 = vmatpush3.bf16.msra.mxu1 %v5001_v41 }
 0x1a7   : > { %4556 = vmatprep.subr.bf16.mxu1 %v5004_v43 }
 0x1aa   : > { %4557 = vmatpush3.bf16.msra.mxu1 %v5005_v45 }
 0x1ab   : > { %4558 = vmatprep.subr.bf16.mxu1 %v5008_v47 }
 0x1ae   : > { %4559 = vmatpush3.bf16.msra.mxu1 %v5009_v49 }
 0x1af   : > { %4560 = vmatprep.subr.bf16.mxu1 %v5012_v51 }
 0x1b2   : > { %4561 = vmatpush3.bf16.msra.mxu1 %v5013_v53 }
 0x1b3   : > { %4562 = vmatprep.subr.bf16.mxu1 %v5016_v55 }
 0x1b6   : > { %4563 = vmatpush3.bf16.msra.mxu1 %v5017_v57 }
 0x1b7   : > { %4564 = vmatprep.subr.bf16.mxu1 %v5020_v60 }
 0x1ba   : > { %4565 = vmatpush3.bf16.msra.mxu1 %v5021_v62 }
 0x23d   : > { %v4472_v0 = vpop.f32.mrf.mxu1 }
 0x23e   : > { %v4500_v1 = vpop.f32.mrf.mxu0 }
 0x23f   : > { %v4473_v2 = vpop.f32.mrf.mxu1 }
 0x240   : > { %v4501_v4 = vpop.f32.mrf.mxu0  ;;  %v4474_v15 = vadd.f32 %v4473_v2, %v4472_v0 }
 0x241   : > { %v4475_v3 = vpop.f32.mrf.mxu1  ;;  %v4502_v24 = vadd.f32 %v4501_v4, %v4500_v1 }
 0x242   : > { %v4503_v6 = vpop.f32.mrf.mxu0  ;;  %v1685_v20 = vadd.f32 %v4474_v15, %v4022_v16 }
 0x243   : > { %v4476_v5 = vpop.f32.mrf.mxu1 }
 0x244   : > { %v4504_v8 = vpop.f32.mrf.mxu0  ;;  %v4477_v21 = vadd.f32 %v4476_v5, %v4475_v3  ;;  %v1734_v30 = vadd.f32 %v4502_v24, %v1685_v20 }
 0x245   : > { %v4478_v7 = vpop.f32.mrf.mxu1  ;;  %v4505_v32 = vadd.f32 %v4504_v8, %v4503_v6 }
 0x246   : > { %v4506_v10 = vpop.f32.mrf.mxu0  ;;  %v1688_v59 = vadd.f32 %v4477_v21, %v4022_v16 }
 0x247   : > { %v4479_v9 = vpop.f32.mrf.mxu1 }
 0x248   : > { %v4507_v12 = vpop.f32.mrf.mxu0  ;;  %v4480_v13 = vadd.f32 %v4479_v9, %v4478_v7  ;;  %v1737_v37 = vadd.f32 %v4505_v32, %v1688_v59 }
 0x249   : > { %v4481_v11 = vpop.f32.mrf.mxu1  ;;  %v4508_v22 = vadd.f32 %v4507_v12, %v4506_v10 }
 0x24a   : > { %v4509_v17 = vpop.f32.mrf.mxu0  ;;  %v1693_v18 = vadd.f32 %v4480_v13, %v4022_v16 }
 0x24b   : > { %v4482_v14 = vpop.f32.mrf.mxu1 }
 0x24c   : > { %v4483_v19 = vadd.f32 %v4482_v14, %v4481_v11  ;;  %v4510_v23 = vpop.f32.mrf.mxu0  ;;  %v1742_v26 = vadd.f32 %v4508_v22, %v1693_v18 }
 0x24d   : > { %v4511_v28 = vadd.f32 %v4510_v23, %v4509_v17 }
 0x24e   : > { %v1696_v25 = vadd.f32 %v4483_v19, %v4022_v16 }
 0x250   : > { %v1745_v34 = vadd.f32 %v4511_v28, %v1696_v25  ;;  %v5032_v25 = vld [vmem:[#allocation9 + $0x130] sm:$0xff]  }
 0x25d   : > { %v4758_v27 = vpop.f32.mrf.mxu1 }
 0x25e   : > { %v1791_v29 = vadd.f32 %v4758_v27, %v1742_v26  ;;  %v5033_v27 = vld [vmem:[#allocation9 + $0x128] sm:$0xff]  }
 0x25f   : > { %v1782_v31 = vpop.f32.mrf.mxu1 }
 0x260   : > { %5155 = vtanh.f32 %v1791_v29  ;;  %v1783_v33 = vadd.f32 %v1782_v31, %v1734_v30  ;;  %v5036_v30 = vld [vmem:[#allocation9 + $0x120] sm:$0xff]  }
 0x261   : > { %v4759_v35 = vpop.f32.mrf.mxu1 }
 0x262   : > { %5157 = vtanh.f32 %v1783_v33  ;;  %v1794_v36 = vadd.f32 %v4759_v35, %v1745_v34  ;;  %v5037_v33 = vld [vmem:[#allocation9 + $0x118] sm:$0xff]   ;;  %v5039_v34 = vld [vmem:[#allocation9 + $0x108] sm:$0xff]   ;;  %v5040_v35 = vld [vmem:[#allocation9 + $0x100] sm:$0xff]  }
 0x263   : > { %v1785_v38 = vpop.f32.mrf.mxu1 }
 0x264   : > { %5159 = vtanh.f32 %v1794_v36  ;;  %v1786_v39 = vadd.f32 %v1785_v38, %v1737_v37  ;;  %v5042_v37 = vld [vmem:[#allocation10 + $0x78] sm:$0xff]  }
 0x265   : > { %v5043_v38 = vld [vmem:[#allocation10 + $0x38] sm:$0xff]   ;;  %4588 = vmatprep.subr.bf16.mxu1 %v5042_v37 }
 0x266   : > { %5161 = vtanh.f32 %v1786_v39  ;;  %v5044_v39 = vld [vmem:[#allocation10 + $0xf8] sm:$0xff]  }
 0x26d   : > { %v5156_v40 = vpop.eup %5155 }
 0x26e   : > { %1803 = vst [vmem:[#allocation2 + $0x18] sm:$0xff] %v5156_v40  ;;  %v4340_v41 = vpack.c.bf16 %v5156_v40, %v5156_v40  ;;  %v5045_v40 = vld [vmem:[#allocation10 + $0xb8] sm:$0xff]  }
 0x26f   : > { %v5158_v42 = vpop.eup %5157 }
 0x270   : > { %1801 = vst [vmem:[#allocation2 + $0x8] sm:$0xff] %v5158_v42  ;;  %v4338_v43 = vpack.c.bf16 %v5158_v42, %v5158_v42  ;;  %1875 = vst [vmem:[#allocation4 + $0x30] sm:$0xf] %v4340_v41  ;;  %v5046_v41 = vld [vmem:[#allocation10 + $0x70] sm:$0xff]  }
 0x271   : > { %v5160_v44 = vpop.eup %5159  ;;  %v5047_v42 = vld [vmem:[#allocation10 + $0x30] sm:$0xff]  }
 0x272   : > { %1804 = vst [vmem:[#allocation2 + $0x20] sm:$0xff] %v5160_v44  ;;  %1873 = vst [vmem:[#allocation4 + $0x8] sm:$0xf] %v4338_v43  ;;  %v4341_v45 = vpack.c.bf16 %v5160_v44, %v5160_v44  ;;  %v5048_v43 = vld [vmem:[#allocation10 + $0xf0] sm:$0xff]  }
 0x273   : > { %v5162_v46 = vpop.eup %5161  ;;  %v5049_v44 = vld [vmem:[#allocation10 + $0xb0] sm:$0xff]  }
 0x274   : > { %1802 = vst [vmem:[#allocation2 + $0x10] sm:$0xff] %v5162_v46  ;;  %v4339_v47 = vpack.c.bf16 %v5162_v46, %v5162_v46  ;;  %1876 = vst [vmem:[#allocation4 + $0x44] sm:$0xf] %v4341_v45  ;;  %v5050_v45 = vld [vmem:[#allocation10 + $0x68] sm:$0xff]  }
 0x275   : > { %v5051_v46 = vld [vmem:[#allocation10 + $0x28] sm:$0xff]  }
 0x276   : > { %1874 = vst [vmem:[#allocation4 + $0x1c] sm:$0xf] %v4339_v47  ;;  %v5052_v47 = vld [vmem:[#allocation10 + $0xe8] sm:$0xff]  }
 0x277   : > { %v1805_v48 = vld [vmem:[#allocation2 + $0x6] sm:$0xff] }
 0x278   : > { %v1829_v49 = vld [vmem:[#allocation2 + $0x7] sm:$0xff]  ;;  %v4330_v50 = vpack.c.bf16 %v1805_v48, %v1805_v48  ;;  %v5053_v48 = vld [vmem:[#allocation10 + $0xa8] sm:$0xff]  }
 0x279   : > { %v4334_v51 = vpack.c.bf16 %v1829_v49, %v1829_v49  ;;  %v1808_v52 = vld [vmem:[#allocation2 + $0x1e] sm:$0xff]  ;;  %v5054_v49 = vld [vmem:[#allocation10 + $0x60] sm:$0xff]  }
 0x27a   : > { %v1832_v53 = vld [vmem:[#allocation2 + $0x1f] sm:$0xff]  ;;  %1825 = vst [vmem:[#allocation4] sm:$0xf] %v4330_v50  ;;  %v4333_v55 = vpack.c.bf16 %v1808_v52, %v1808_v52  ;;  %v5055_v50 = vld [vmem:[#allocation10 + $0x20] sm:$0xff]  }
 0x27b   : > { %v1879_v54 = vld [vmem:[#allocation2 + $0x19] sm:$0xff]  ;;  %1849 = vst [vmem:[#allocation4 + $0x4] sm:$0xf] %v4334_v51  ;;  %v4337_v56 = vpack.c.bf16 %v1832_v53, %v1832_v53  ;;  %v1880_v57 = vld [vmem:[#allocation2 + $0x21] sm:$0xff]  ;;  %v1806_v62 = vld [vmem:[#allocation2 + $0xe] sm:$0xff] }
 0x27c   : > { %v4344_v58 = vpack.c.bf16 %v1879_v54, %v1879_v54  ;;  %v1903_v60 = vld [vmem:[#allocation2 + $0x1a] sm:$0xff]  ;;  %v1904_v61 = vld [vmem:[#allocation2 + $0x22] sm:$0xff]  ;;  %v1830_v0 = vld [vmem:[#allocation2 + $0xf] sm:$0xff]  ;;  %v4345_v2 = vpack.c.bf16 %v1880_v57, %v1880_v57  ;;  %v4331_v5 = vpack.c.bf16 %v1806_v62, %v1806_v62  ;;  %1828 = vst [vmem:[#allocation4 + $0x3c] sm:$0xf] %v4333_v55 }
 0x27d   : > { %v1877_v1 = vld [vmem:[#allocation2 + $0x9] sm:$0xff]  ;;  %v4348_v3 = vpack.c.bf16 %v1903_v60, %v1903_v60  ;;  %v4349_v4 = vpack.c.bf16 %v1904_v61, %v1904_v61  ;;  %v4335_v6 = vpack.c.bf16 %v1830_v0, %v1830_v0  ;;  %v1878_v7 = vld [vmem:[#allocation2 + $0x11] sm:$0xff]  ;;  %1852 = vst [vmem:[#allocation4 + $0x40] sm:$0xf] %v4337_v56  ;;  %v5062_v57 = vld [vmem:[#allocation10 + $0x50] sm:$0xff]  }
 0x27e   : > { %v4342_v8 = vpack.c.bf16 %v1877_v1, %v1877_v1  ;;  %v1807_v9 = vld [vmem:[#allocation2 + $0x16] sm:$0xff]  ;;  %1899 = vst [vmem:[#allocation4 + $0x34] sm:$0xf] %v4344_v58  ;;  %v4343_v11 = vpack.c.bf16 %v1878_v7, %v1878_v7  ;;  %1900 = vst [vmem:[#allocation4 + $0x48] sm:$0xf] %v4345_v2  ;;  %v1901_v14 = vld [vmem:[#allocation2 + $0xa] sm:$0xff] }
 0x27f   : > { %v1831_v10 = vld [vmem:[#allocation2 + $0x17] sm:$0xff]  ;;  %v4332_v12 = vpack.c.bf16 %v1807_v9, %v1807_v9  ;;  %1923 = vst [vmem:[#allocation4 + $0x38] sm:$0xf] %v4348_v3  ;;  %1924 = vst [vmem:[#allocation4 + $0x4c] sm:$0xf] %v4349_v4  ;;  %v4346_v16 = vpack.c.bf16 %v1901_v14, %v1901_v14  ;;  %v5058_v53 = vld [vmem:[#allocation10 + $0x58] sm:$0xff]  }
 0x280   : > { %v4336_v13 = vpack.c.bf16 %v1831_v10, %v1831_v10  ;;  %v1902_v15 = vld [vmem:[#allocation2 + $0x12] sm:$0xff]  ;;  %1826 = vst [vmem:[#allocation4 + $0x14] sm:$0xf] %v4331_v5  ;;  %1850 = vst [vmem:[#allocation4 + $0x18] sm:$0xf] %v4335_v6  ;;  %v5060_v54 = vld [vmem:[#allocation10 + $0xd8] sm:$0xff]  }
 0x281   : > { %1897 = vst [vmem:[#allocation4 + $0xc] sm:$0xf] %v4342_v8  ;;  %v4347_v17 = vpack.c.bf16 %v1902_v15, %v1902_v15  ;;  %1898 = vst [vmem:[#allocation4 + $0x20] sm:$0xf] %v4343_v11  ;;  %v5027_v23 = vld [vmem:[#allocation4 + $0x8] ss:$20 sps:$4 sm:$0xff]  }
 0x282   : > { %1827 = vst [vmem:[#allocation4 + $0x28] sm:$0xf] %v4332_v12  ;;  %1851 = vst [vmem:[#allocation4 + $0x2c] sm:$0xf] %v4336_v13  ;;  %v1925_v18 = vld [vmem:[#allocation4] sm:$0xff]  ;;  %v5056_v51 = vld [vmem:[#allocation10 + $0xe0] sm:$0xff]  }
 0x283   : > { %1921 = vst [vmem:[#allocation4 + $0x10] sm:$0xf] %v4346_v16  ;;  %1922 = vst [vmem:[#allocation4 + $0x24] sm:$0xf] %v4347_v17  ;;  %v5034_v31 = vld [vmem:[#allocation4 + $0x30] ss:$20 sps:$4 sm:$0xff]  }
 0x284   : > { %v1934_v28 = vld [vmem:[#allocation4 + $0x3c] sm:$0xff]  ;;  %v5057_v52 = vld [vmem:[#allocation10 + $0xa0] sm:$0xff]   ;;  %v5059_v55 = vld [vmem:[#allocation10 + $0x18] sm:$0xff]  }
 0x285   : > { %v5030_v24 = vld [vmem:[#allocation4 + $0x34] ss:$20 sps:$4 sm:$0xff]   ;;  %v5064_v58 = vld [vmem:[#allocation10 + $0xd0] sm:$0xff]   ;;  %v5066_v62 = vld [vmem:[#allocation10 + $0x48] sm:$0xff]  }
 0x286   : > { %v5041_v36 = vld [vmem:[#allocation4 + $0x38] ss:$20 sps:$4 sm:$0xff]   ;;  %v5063_v60 = vld [vmem:[#allocation10 + $0x10] sm:$0xff]   ;;  %v5070_v3 = vld [vmem:[#allocation10 + $0x40] sm:$0xff]  }
 0x287   : > { %v1928_v19 = vld [vmem:[#allocation4 + $0x14] sm:$0xff]  ;;  %v5061_v56 = vld [vmem:[#allocation10 + $0x98] sm:$0xff]   ;;  %v5065_v61 = vld [vmem:[#allocation10 + $0x90] sm:$0xff]  }
 0x288   : > { %v5022_v20 = vld [vmem:[#allocation4 + $0x4] ss:$20 sps:$4 sm:$0xff]   ;;  %v5024_v21 = vld [vmem:[#allocation4 + $0xc] ss:$20 sps:$4 sm:$0xff]   ;;  %v4094_v22 = vcombine.low %v1925_v18, %v1928_v19  ;;  %v5072_v4 = vld [vmem:[#allocation10 + $0xc0] sm:$0xff]  }
 0x289   : > { %2348 = vmatprep.mubr.bf16.mxu0 %v5022_v20  ;;  %2397 = vmatprep.mubr.bf16.mxu1 %v5024_v21  ;;  %v5028_v26 = vld [vmem:[#allocation4 + $0x2c] ss:$20 sps:$4 sm:$0xff]   ;;  %v5068_v0 = vld [vmem:[#allocation10 + $0xc8] sm:$0xff]   ;;  %v5071_v5 = vld [vmem:[#allocation10] sm:$0xff]  }
 0x28a   : > { %2349 = vmatmul.mubr.bf16.vlgmr.msra.gmra.mxu0 %v4094_v22  ;;  %2398 = vmatmul.mubr.bf16.vlgmr.msra.gmra.mxu1 %v5027_v23  ;;  %v1931_v59 = vld [vmem:[#allocation4 + $0x28] sm:$0xff]  ;;  %v5035_v32 = vld [vmem:[#allocation4 + $0x10] ss:$20 sps:$4 sm:$0xff]   ;;  %v5067_v1 = vld [vmem:[#allocation10 + $0x8] sm:$0xff]  }
 0x28b   : > { %4761 = vmatpush3.bf16.msra.mxu0 %v5534_v63  ;;  %2356 = vmatprep.mubr.bf16.mxu0 %v5028_v26  ;;  %v4099_v29 = vcombine.low %v1931_v59, %v1934_v28  ;;  %v5038_v63 = vld [vmem:[#allocation9 + $0x110] sm:$0xff]   ;;  %v5069_v2 = vld [vmem:[#allocation10 + $0x88] sm:$0xff]   ;;  %v5073_v6 = vld [vmem:[#allocation10 + $0x80] sm:$0xff]  }
 0x28c   : > { %2405 = vmatprep.mubr.bf16.mxu1 %v5030_v24  ;;  %4762 = vmatprep.subr.bf16.mxu0 %v5032_v25  ;;  %v5541_v7 = vld [vmem:[#allocation10 + $0x138] sm:$0xff]   ;;  %v4093_v24 = vld [vmem:[%s5578_s8] ss:$0 sm:$0xff] }
 0x28d   : > { %4589 = vmatpush3.bf16.msra.mxu1 %v5043_v38 }
 0x28e   : > { %4590 = vmatprep.subr.bf16.mxu1 %v5046_v41 }
 0x28f   : > { %4763 = vmatpush3.bf16.msra.mxu0 %v5032_v25 }
 0x290   : > { %4764 = vmatprep.subr.bf16.mxu0 %v5033_v27 }
 0x291   : > { %4591 = vmatpush3.bf16.msra.mxu1 %v5047_v42 }
 0x292   : > { %2357 = vmatmul.mubr.bf16.gmra.mxu0 %v4099_v29  ;;  %2406 = vmatmul.mubr.bf16.gmra.mxu1 %v5034_v31 }
 0x293   : > { %4765 = vmatpush3.bf16.msra.mxu0 %v5033_v27  ;;  %4776 = vmatprep.mubr.bf16.mxu0 %v5035_v32 }
 0x294   : > { %4766 = vmatprep.subr.bf16.mxu0 %v5036_v30  ;;  %4592 = vmatprep.subr.bf16.mxu1 %v5050_v45 }
 0x295   : > { %4593 = vmatpush3.bf16.msra.mxu1 %v5051_v46 }
 0x296   : > { %4594 = vmatprep.subr.bf16.mxu1 %v5054_v49 }
 0x297   : > { %4767 = vmatpush3.bf16.msra.mxu0 %v5036_v30 }
 0x298   : > { %4768 = vmatprep.subr.bf16.mxu0 %v5037_v33 }
 0x299   : > { %4595 = vmatpush3.bf16.msra.mxu1 %v5055_v50 }
 0x29a   : > { %4596 = vmatprep.subr.bf16.mxu1 %v5058_v53 }
 0x29b   : > { %4769 = vmatpush3.bf16.msra.mxu0 %v5037_v33 }
 0x29c   : > { %4770 = vmatprep.subr.bf16.mxu0 %v5038_v63 }
 0x29d   : > { %4597 = vmatpush3.bf16.msra.mxu1 %v5059_v55 }
 0x29e   : > { %4598 = vmatprep.subr.bf16.mxu1 %v5062_v57 }
 0x29f   : > { %4771 = vmatpush3.bf16.msra.mxu0 %v5038_v63 }
 0x2a0   : > { %4772 = vmatprep.subr.bf16.mxu0 %v5039_v34 }
 0x2a1   : > { %4599 = vmatpush3.bf16.msra.mxu1 %v5063_v60 }
 0x2a2   : > { %4600 = vmatprep.subr.bf16.mxu1 %v5066_v62 }
 0x2a3   : > { %4773 = vmatpush3.bf16.msra.mxu0 %v5039_v34 }
 0x2a4   : > { %4774 = vmatprep.subr.bf16.mxu0 %v5040_v35 }
 0x2a5   : > { %4601 = vmatpush3.bf16.msra.mxu1 %v5067_v1 }
 0x2a6   : > { %4602 = vmatprep.subr.bf16.mxu1 %v5070_v3 }
 0x2a7   : > { %4775 = vmatpush3.bf16.msra.mxu0 %v5040_v35 }
 0x2a8   : > { %4616 = vmatprep.subr.bf16.mxu0 %v5044_v39 }
 0x2a9   : > { %4603 = vmatpush3.bf16.msra.mxu1 %v5071_v5 }
 0x2aa   : > { %4777 = vmatmul.mubr.bf16.vlgmr.msra.gmra.mxu0 %v5041_v36  ;;  %4780 = vmatprep.subr.bf16.mxu1 %v5541_v7 }
 0x2ab   : > { %4617 = vmatpush3.bf16.msra.mxu0 %v5045_v40 }
 0x2ac   : > { %4618 = vmatprep.subr.bf16.mxu0 %v5048_v43 }
 0x2af   : > { %4619 = vmatpush3.bf16.msra.mxu0 %v5049_v44 }
 0x2b0   : > { %4620 = vmatprep.subr.bf16.mxu0 %v5052_v47 }
 0x2b3   : > { %4621 = vmatpush3.bf16.msra.mxu0 %v5053_v48 }
 0x2b4   : > { %4622 = vmatprep.subr.bf16.mxu0 %v5056_v51 }
 0x2b7   : > { %4623 = vmatpush3.bf16.msra.mxu0 %v5057_v52 }
 0x2b8   : > { %4624 = vmatprep.subr.bf16.mxu0 %v5060_v54 }
 0x2bb   : > { %4625 = vmatpush3.bf16.msra.mxu0 %v5061_v56 }
 0x2bc   : > { %4626 = vmatprep.subr.bf16.mxu0 %v5064_v58 }
 0x2bf   : > { %4627 = vmatpush3.bf16.msra.mxu0 %v5065_v61 }
 0x2c0   : > { %4628 = vmatprep.subr.bf16.mxu0 %v5068_v0 }
 0x2c3   : > { %4629 = vmatpush3.bf16.msra.mxu0 %v5069_v2 }
 0x2c4   : > { %4630 = vmatprep.subr.bf16.mxu0 %v5072_v4 }
 0x2c7   : > { %4631 = vmatpush3.bf16.msra.mxu0 %v5073_v6 }
 0x34a   : > { %v4538_v8 = vpop.f32.mrf.mxu0  ;;  %v4566_v9 = vpop.f32.mrf.mxu1 }
 0x34c   : > { %v4539_v10 = vpop.f32.mrf.mxu0  ;;  %v4567_v12 = vpop.f32.mrf.mxu1 }
 0x34d   : > { %v4540_v23 = vadd.f32 %v4539_v10, %v4538_v8  ;;  %v4568_v31 = vadd.f32 %v4567_v12, %v4566_v9 }
 0x34e   : > { %v4541_v11 = vpop.f32.mrf.mxu0  ;;  %v4569_v14 = vpop.f32.mrf.mxu1 }
 0x34f   : > { %v2351_v59 = vadd.f32 %v4540_v23, %v4093_v24 }
 0x350   : > { %v4542_v13 = vpop.f32.mrf.mxu0  ;;  %v4570_v16 = vpop.f32.mrf.mxu1 }
 0x351   : > { %v4543_v28 = vadd.f32 %v4542_v13, %v4541_v11  ;;  %v2400_v37 = vadd.f32 %v4568_v31, %v2351_v59  ;;  %v4571_v39 = vadd.f32 %v4570_v16, %v4569_v14 }
 0x352   : > { %v4544_v15 = vpop.f32.mrf.mxu0  ;;  %v4572_v18 = vpop.f32.mrf.mxu1 }
 0x353   : > { %v2354_v34 = vadd.f32 %v4543_v28, %v4093_v24 }
 0x354   : > { %v4545_v17 = vpop.f32.mrf.mxu0  ;;  %v4573_v20 = vpop.f32.mrf.mxu1 }
 0x355   : > { %v4546_v21 = vadd.f32 %v4545_v17, %v4544_v15  ;;  %v4574_v29 = vadd.f32 %v4573_v20, %v4572_v18  ;;  %v2403_v44 = vadd.f32 %v4571_v39, %v2354_v34 }
 0x356   : > { %v4547_v19 = vpop.f32.mrf.mxu0  ;;  %v4575_v25 = vpop.f32.mrf.mxu1 }
 0x357   : > { %v2359_v26 = vadd.f32 %v4546_v21, %v4093_v24 }
 0x358   : > { %v4548_v22 = vpop.f32.mrf.mxu0  ;;  %v4576_v30 = vpop.f32.mrf.mxu1 }
 0x359   : > { %v4549_v27 = vadd.f32 %v4548_v22, %v4547_v19  ;;  %v2408_v33 = vadd.f32 %v4574_v29, %v2359_v26  ;;  %v4577_v35 = vadd.f32 %v4576_v30, %v4575_v25 }
 0x35b   : > { %v2362_v32 = vadd.f32 %v4549_v27, %v4093_v24 }
 0x35d   : > { %v2411_v41 = vadd.f32 %v4577_v35, %v2362_v32  ;;  %v5084_v32 = vld [vmem:[#allocation10 + $0x130] sm:$0xff]  }
 0x36a   : > { %v4778_v63 = vpop.f32.mrf.mxu0 }
 0x36b   : > { %v2457_v36 = vadd.f32 %v4778_v63, %v2408_v33  ;;  %v5085_v63 = vld [vmem:[#allocation10 + $0x128] sm:$0xff]  }
 0x36c   : > { %v2448_v38 = vpop.f32.mrf.mxu0 }
 0x36d   : > { %5163 = vtanh.f32 %v2457_v36  ;;  %v2449_v40 = vadd.f32 %v2448_v38, %v2400_v37  ;;  %v5088_v37 = vld [vmem:[#allocation10 + $0x120] sm:$0xff]  }
 0x36e   : > { %v4779_v42 = vpop.f32.mrf.mxu0 }
 0x36f   : > { %5165 = vtanh.f32 %v2449_v40  ;;  %v2460_v43 = vadd.f32 %v4779_v42, %v2411_v41  ;;  %v5089_v40 = vld [vmem:[#allocation10 + $0x118] sm:$0xff]   ;;  %v5091_v41 = vld [vmem:[#allocation10 + $0x108] sm:$0xff]   ;;  %v5092_v42 = vld [vmem:[#allocation10 + $0x100] sm:$0xff]  }
 0x370   : > { %v2451_v45 = vpop.f32.mrf.mxu0 }
 0x371   : > { %5167 = vtanh.f32 %v2460_v43  ;;  %v2452_v46 = vadd.f32 %v2451_v45, %v2403_v44  ;;  %v5094_v44 = vld [vmem:[#allocation12 + $0x78] sm:$0xff]  }
 0x372   : > { %v5095_v45 = vld [vmem:[#allocation12 + $0x38] sm:$0xff]   ;;  %4654 = vmatprep.subr.bf16.mxu0 %v5094_v44 }
 0x373   : > { %5169 = vtanh.f32 %v2452_v46  ;;  %v5096_v46 = vld [vmem:[#allocation12 + $0xf8] sm:$0xff]  }
 0x37a   : > { %v5164_v47 = vpop.eup %5163 }
 0x37b   : > { %2469 = vst [vmem:[#allocation3 + $0x18] sm:$0xff] %v5164_v47  ;;  %v4360_v48 = vpack.c.bf16 %v5164_v47, %v5164_v47  ;;  %v5097_v47 = vld [vmem:[#allocation12 + $0xb8] sm:$0xff]  }
 0x37c   : > { %v5166_v49 = vpop.eup %5165 }
 0x37d   : > { %2467 = vst [vmem:[#allocation3 + $0x8] sm:$0xff] %v5166_v49  ;;  %v4358_v50 = vpack.c.bf16 %v5166_v49, %v5166_v49  ;;  %2541 = vst [vmem:[#allocation4 + $0x30] sm:$0xf] %v4360_v48  ;;  %v5098_v48 = vld [vmem:[#allocation12 + $0x70] sm:$0xff]  }
 0x37e   : > { %v5168_v51 = vpop.eup %5167  ;;  %v5099_v49 = vld [vmem:[#allocation12 + $0x30] sm:$0xff]  }
 0x37f   : > { %2470 = vst [vmem:[#allocation3 + $0x20] sm:$0xff] %v5168_v51  ;;  %2539 = vst [vmem:[#allocation4 + $0x8] sm:$0xf] %v4358_v50  ;;  %v4361_v52 = vpack.c.bf16 %v5168_v51, %v5168_v51  ;;  %v5100_v50 = vld [vmem:[#allocation12 + $0xf0] sm:$0xff]  }
 0x380   : > { %v5170_v53 = vpop.eup %5169  ;;  %v5101_v51 = vld [vmem:[#allocation12 + $0xb0] sm:$0xff]  }
 0x381   : > { %2468 = vst [vmem:[#allocation3 + $0x10] sm:$0xff] %v5170_v53  ;;  %v4359_v54 = vpack.c.bf16 %v5170_v53, %v5170_v53  ;;  %2542 = vst [vmem:[#allocation4 + $0x44] sm:$0xf] %v4361_v52  ;;  %v5102_v52 = vld [vmem:[#allocation12 + $0x68] sm:$0xff]  }
 0x382   : > { %v5103_v53 = vld [vmem:[#allocation12 + $0x28] sm:$0xff]  }
 0x383   : > { %2540 = vst [vmem:[#allocation4 + $0x1c] sm:$0xf] %v4359_v54  ;;  %v5104_v54 = vld [vmem:[#allocation12 + $0xe8] sm:$0xff]  }
 0x384   : > { %v2471_v55 = vld [vmem:[#allocation3 + $0x6] sm:$0xff] }
 0x385   : > { %v2495_v56 = vld [vmem:[#allocation3 + $0x7] sm:$0xff]  ;;  %v4350_v57 = vpack.c.bf16 %v2471_v55, %v2471_v55 }
 0x386   : > { %v4354_v58 = vpack.c.bf16 %v2495_v56, %v2495_v56  ;;  %v2474_v60 = vld [vmem:[#allocation3 + $0x1e] sm:$0xff]  ;;  %v5105_v55 = vld [vmem:[#allocation12 + $0xa8] sm:$0xff]  }
 0x387   : > { %v2498_v61 = vld [vmem:[#allocation3 + $0x1f] sm:$0xff]  ;;  %2491 = vst [vmem:[#allocation4] sm:$0xf] %v4350_v57  ;;  %v4353_v0 = vpack.c.bf16 %v2474_v60, %v2474_v60 }
 0x388   : > { %v2545_v62 = vld [vmem:[#allocation3 + $0x19] sm:$0xff]  ;;  %2515 = vst [vmem:[#allocation4 + $0x4] sm:$0xf] %v4354_v58  ;;  %v4357_v1 = vpack.c.bf16 %v2498_v61, %v2498_v61  ;;  %v2546_v2 = vld [vmem:[#allocation3 + $0x21] sm:$0xff]  ;;  %v2472_v6 = vld [vmem:[#allocation3 + $0xe] sm:$0xff] }
 0x389   : > { %v4364_v3 = vpack.c.bf16 %v2545_v62, %v2545_v62  ;;  %v2569_v4 = vld [vmem:[#allocation3 + $0x1a] sm:$0xff]  ;;  %v2570_v5 = vld [vmem:[#allocation3 + $0x22] sm:$0xff]  ;;  %v2496_v8 = vld [vmem:[#allocation3 + $0xf] sm:$0xff]  ;;  %v4365_v10 = vpack.c.bf16 %v2546_v2, %v2546_v2  ;;  %v4351_v13 = vpack.c.bf16 %v2472_v6, %v2472_v6  ;;  %2494 = vst [vmem:[#allocation4 + $0x3c] sm:$0xf] %v4353_v0 }
 0x38a   : > { %v2543_v9 = vld [vmem:[#allocation3 + $0x9] sm:$0xff]  ;;  %v4368_v11 = vpack.c.bf16 %v2569_v4, %v2569_v4  ;;  %v4369_v12 = vpack.c.bf16 %v2570_v5, %v2570_v5  ;;  %v4355_v14 = vpack.c.bf16 %v2496_v8, %v2496_v8  ;;  %v2544_v15 = vld [vmem:[#allocation3 + $0x11] sm:$0xff]  ;;  %2518 = vst [vmem:[#allocation4 + $0x40] sm:$0xf] %v4357_v1  ;;  %v5106_v56 = vld [vmem:[#allocation12 + $0x60] sm:$0xff]  }
 0x38b   : > { %v4362_v16 = vpack.c.bf16 %v2543_v9, %v2543_v9  ;;  %v2473_v17 = vld [vmem:[#allocation3 + $0x16] sm:$0xff]  ;;  %2565 = vst [vmem:[#allocation4 + $0x34] sm:$0xf] %v4364_v3  ;;  %v4363_v19 = vpack.c.bf16 %v2544_v15, %v2544_v15  ;;  %2566 = vst [vmem:[#allocation4 + $0x48] sm:$0xf] %v4365_v10  ;;  %v2567_v22 = vld [vmem:[#allocation3 + $0xa] sm:$0xff] }
 0x38c   : > { %v2497_v18 = vld [vmem:[#allocation3 + $0x17] sm:$0xff]  ;;  %v4352_v20 = vpack.c.bf16 %v2473_v17, %v2473_v17  ;;  %2589 = vst [vmem:[#allocation4 + $0x38] sm:$0xf] %v4368_v11  ;;  %2590 = vst [vmem:[#allocation4 + $0x4c] sm:$0xf] %v4369_v12  ;;  %v4366_v24 = vpack.c.bf16 %v2567_v22, %v2567_v22  ;;  %v5107_v57 = vld [vmem:[#allocation12 + $0x20] sm:$0xff]  }
 0x38d   : > { %v4356_v21 = vpack.c.bf16 %v2497_v18, %v2497_v18  ;;  %v2568_v23 = vld [vmem:[#allocation3 + $0x12] sm:$0xff]  ;;  %2492 = vst [vmem:[#allocation4 + $0x14] sm:$0xf] %v4351_v13  ;;  %2516 = vst [vmem:[#allocation4 + $0x18] sm:$0xf] %v4355_v14  ;;  %v5108_v58 = vld [vmem:[#allocation12 + $0xe0] sm:$0xff]  }
 0x38e   : > { %2563 = vst [vmem:[#allocation4 + $0xc] sm:$0xf] %v4362_v16  ;;  %v4367_v25 = vpack.c.bf16 %v2568_v23, %v2568_v23  ;;  %2564 = vst [vmem:[#allocation4 + $0x20] sm:$0xf] %v4363_v19  ;;  %v5079_v30 = vld [vmem:[#allocation4 + $0x8] ss:$20 sps:$4 sm:$0xff]  }
 0x38f   : > { %2493 = vst [vmem:[#allocation4 + $0x28] sm:$0xf] %v4352_v20  ;;  %2517 = vst [vmem:[#allocation4 + $0x2c] sm:$0xf] %v4356_v21  ;;  %v2591_v26 = vld [vmem:[#allocation4] sm:$0xff]  ;;  %v5109_v60 = vld [vmem:[#allocation12 + $0xa0] sm:$0xff]  }
 0x390   : > { %2587 = vst [vmem:[#allocation4 + $0x10] sm:$0xf] %v4366_v24  ;;  %2588 = vst [vmem:[#allocation4 + $0x24] sm:$0xf] %v4367_v25  ;;  %v5086_v38 = vld [vmem:[#allocation4 + $0x30] ss:$20 sps:$4 sm:$0xff]  }
 0x391   : > { %v2600_v35 = vld [vmem:[#allocation4 + $0x3c] sm:$0xff]  ;;  %v5110_v61 = vld [vmem:[#allocation12 + $0x58] sm:$0xff]   ;;  %v5122_v11 = vld [vmem:[#allocation12 + $0x40] sm:$0xff]  }
 0x392   : > { %v5082_v31 = vld [vmem:[#allocation4 + $0x34] ss:$20 sps:$4 sm:$0xff]   ;;  %v5114_v2 = vld [vmem:[#allocation12 + $0x50] sm:$0xff]   ;;  %v5118_v6 = vld [vmem:[#allocation12 + $0x48] sm:$0xff]  }
 0x393   : > { %v5093_v43 = vld [vmem:[#allocation4 + $0x38] ss:$20 sps:$4 sm:$0xff]   ;;  %v5116_v3 = vld [vmem:[#allocation12 + $0xd0] sm:$0xff]   ;;  %v5124_v12 = vld [vmem:[#allocation12 + $0xc0] sm:$0xff]  }
 0x394   : > { %v2594_v27 = vld [vmem:[#allocation4 + $0x14] sm:$0xff]  ;;  %v5112_v62 = vld [vmem:[#allocation12 + $0xd8] sm:$0xff]   ;;  %v5115_v4 = vld [vmem:[#allocation12 + $0x10] sm:$0xff]  }
 0x395   : > { %v5074_v59 = vld [vmem:[#allocation4 + $0x4] ss:$20 sps:$4 sm:$0xff]   ;;  %v5076_v28 = vld [vmem:[#allocation4 + $0xc] ss:$20 sps:$4 sm:$0xff]   ;;  %v4165_v29 = vcombine.low %v2591_v26, %v2594_v27  ;;  %v5123_v13 = vld [vmem:[#allocation12] sm:$0xff]  }
 0x396   : > { %3014 = vmatprep.mubr.bf16.mxu1 %v5074_v59  ;;  %3063 = vmatprep.mubr.bf16.mxu0 %v5076_v28  ;;  %v5080_v33 = vld [vmem:[#allocation4 + $0x2c] ss:$20 sps:$4 sm:$0xff]   ;;  %v5120_v8 = vld [vmem:[#allocation12 + $0xc8] sm:$0xff]   ;;  %v5125_v14 = vld [vmem:[#allocation12 + $0x80] sm:$0xff]  }
 0x397   : > { %3015 = vmatmul.mubr.bf16.vlgmr.msra.gmra.mxu1 %v4165_v29  ;;  %3064 = vmatmul.mubr.bf16.vlgmr.msra.gmra.mxu0 %v5079_v30  ;;  %v2597_v34 = vld [vmem:[#allocation4 + $0x28] sm:$0xff]  ;;  %v5087_v39 = vld [vmem:[#allocation4 + $0x10] ss:$20 sps:$4 sm:$0xff]   ;;  %v5119_v9 = vld [vmem:[#allocation12 + $0x8] sm:$0xff]  }
 0x398   : > { %4781 = vmatpush3.bf16.msra.mxu1 %v5541_v7  ;;  %3022 = vmatprep.mubr.bf16.mxu1 %v5080_v33  ;;  %v4170_v36 = vcombine.low %v2597_v34, %v2600_v35  ;;  %v5090_v7 = vld [vmem:[#allocation10 + $0x110] sm:$0xff]   ;;  %v5111_v0 = vld [vmem:[#allocation12 + $0x18] sm:$0xff]   ;;  %v5121_v10 = vld [vmem:[#allocation12 + $0x88] sm:$0xff]  }
 0x399   : > { %3071 = vmatprep.mubr.bf16.mxu0 %v5082_v31  ;;  %4782 = vmatprep.subr.bf16.mxu1 %v5084_v32  ;;  %v5113_v1 = vld [vmem:[#allocation12 + $0x98] sm:$0xff]   ;;  %v5117_v5 = vld [vmem:[#allocation12 + $0x90] sm:$0xff]  }
 0x39a   : > { %4655 = vmatpush3.bf16.msra.mxu0 %v5095_v45  ;;  %v5548_v15 = vld [vmem:[#allocation12 + $0x138] sm:$0xff]   ;;  %v4164_v31 = vld [vmem:[%s5579_s9] ss:$0 sm:$0xff] }
 0x39b   : > { %4656 = vmatprep.subr.bf16.mxu0 %v5098_v48 }
 0x39c   : > { %4783 = vmatpush3.bf16.msra.mxu1 %v5084_v32 }
 0x39d   : > { %4784 = vmatprep.subr.bf16.mxu1 %v5085_v63 }
 0x39e   : > { %4657 = vmatpush3.bf16.msra.mxu0 %v5099_v49 }
 0x39f   : > { %3023 = vmatmul.mubr.bf16.gmra.mxu1 %v4170_v36  ;;  %3072 = vmatmul.mubr.bf16.gmra.mxu0 %v5086_v38 }
 0x3a0   : > { %4785 = vmatpush3.bf16.msra.mxu1 %v5085_v63  ;;  %4796 = vmatprep.mubr.bf16.mxu1 %v5087_v39 }
 0x3a1   : > { %4786 = vmatprep.subr.bf16.mxu1 %v5088_v37  ;;  %4658 = vmatprep.subr.bf16.mxu0 %v5102_v52 }
 0x3a2   : > { %4659 = vmatpush3.bf16.msra.mxu0 %v5103_v53 }
 0x3a3   : > { %4660 = vmatprep.subr.bf16.mxu0 %v5106_v56 }
 0x3a4   : > { %4787 = vmatpush3.bf16.msra.mxu1 %v5088_v37 }
 0x3a5   : > { %4788 = vmatprep.subr.bf16.mxu1 %v5089_v40 }
 0x3a6   : > { %4661 = vmatpush3.bf16.msra.mxu0 %v5107_v57 }
 0x3a7   : > { %4662 = vmatprep.subr.bf16.mxu0 %v5110_v61 }
 0x3a8   : > { %4789 = vmatpush3.bf16.msra.mxu1 %v5089_v40 }
 0x3a9   : > { %4790 = vmatprep.subr.bf16.mxu1 %v5090_v7 }
 0x3aa   : > { %4663 = vmatpush3.bf16.msra.mxu0 %v5111_v0 }
 0x3ab   : > { %4664 = vmatprep.subr.bf16.mxu0 %v5114_v2 }
 0x3ac   : > { %4791 = vmatpush3.bf16.msra.mxu1 %v5090_v7 }
 0x3ad   : > { %4792 = vmatprep.subr.bf16.mxu1 %v5091_v41 }
 0x3ae   : > { %4665 = vmatpush3.bf16.msra.mxu0 %v5115_v4 }
 0x3af   : > { %4666 = vmatprep.subr.bf16.mxu0 %v5118_v6 }
 0x3b0   : > { %4793 = vmatpush3.bf16.msra.mxu1 %v5091_v41 }
 0x3b1   : > { %4794 = vmatprep.subr.bf16.mxu1 %v5092_v42 }
 0x3b2   : > { %4667 = vmatpush3.bf16.msra.mxu0 %v5119_v9 }
 0x3b3   : > { %4668 = vmatprep.subr.bf16.mxu0 %v5122_v11 }
 0x3b4   : > { %4795 = vmatpush3.bf16.msra.mxu1 %v5092_v42 }
 0x3b5   : > { %4682 = vmatprep.subr.bf16.mxu1 %v5096_v46 }
 0x3b6   : > { %4669 = vmatpush3.bf16.msra.mxu0 %v5123_v13 }
 0x3b7   : > { %4797 = vmatmul.mubr.bf16.vlgmr.msra.gmra.mxu1 %v5093_v43  ;;  %4800 = vmatprep.subr.bf16.mxu0 %v5548_v15 }
 0x3b8   : > { %4683 = vmatpush3.bf16.msra.mxu1 %v5097_v47 }
 0x3b9   : > { %4684 = vmatprep.subr.bf16.mxu1 %v5100_v50 }
 0x3bc   : > { %4685 = vmatpush3.bf16.msra.mxu1 %v5101_v51 }
 0x3bd   : > { %4686 = vmatprep.subr.bf16.mxu1 %v5104_v54 }
 0x3c0   : > { %4687 = vmatpush3.bf16.msra.mxu1 %v5105_v55 }
 0x3c1   : > { %4688 = vmatprep.subr.bf16.mxu1 %v5108_v58 }
 0x3c4   : > { %4689 = vmatpush3.bf16.msra.mxu1 %v5109_v60 }
 0x3c5   : > { %4690 = vmatprep.subr.bf16.mxu1 %v5112_v62 }
 0x3c8   : > { %4691 = vmatpush3.bf16.msra.mxu1 %v5113_v1 }
 0x3c9   : > { %4692 = vmatprep.subr.bf16.mxu1 %v5116_v3 }
 0x3cc   : > { %4693 = vmatpush3.bf16.msra.mxu1 %v5117_v5 }
 0x3cd   : > { %4694 = vmatprep.subr.bf16.mxu1 %v5120_v8 }
 0x3d0   : > { %4695 = vmatpush3.bf16.msra.mxu1 %v5121_v10 }
 0x3d1   : > { %4696 = vmatprep.subr.bf16.mxu1 %v5124_v12 }
 0x3d4   : > { %4697 = vmatpush3.bf16.msra.mxu1 %v5125_v14 }
 0x457   : > { %v4604_v16 = vpop.f32.mrf.mxu1  ;;  %v4632_v17 = vpop.f32.mrf.mxu0 }
 0x459   : > { %v4605_v18 = vpop.f32.mrf.mxu1  ;;  %v4633_v20 = vpop.f32.mrf.mxu0 }
 0x45a   : > { %v4606_v30 = vadd.f32 %v4605_v18, %v4604_v16  ;;  %v4634_v38 = vadd.f32 %v4633_v20, %v4632_v17 }
 0x45b   : > { %v4607_v19 = vpop.f32.mrf.mxu1  ;;  %v4635_v22 = vpop.f32.mrf.mxu0 }
 0x45c   : > { %v3017_v34 = vadd.f32 %v4606_v30, %v4164_v31 }
 0x45d   : > { %v4608_v21 = vpop.f32.mrf.mxu1  ;;  %v4636_v24 = vpop.f32.mrf.mxu0 }
 0x45e   : > { %v4609_v35 = vadd.f32 %v4608_v21, %v4607_v19  ;;  %v3066_v44 = vadd.f32 %v4634_v38, %v3017_v34  ;;  %v4637_v46 = vadd.f32 %v4636_v24, %v4635_v22 }
 0x45f   : > { %v4610_v23 = vpop.f32.mrf.mxu1  ;;  %v4638_v26 = vpop.f32.mrf.mxu0 }
 0x460   : > { %v3020_v41 = vadd.f32 %v4609_v35, %v4164_v31 }
 0x461   : > { %v4611_v25 = vpop.f32.mrf.mxu1  ;;  %v4639_v59 = vpop.f32.mrf.mxu0 }
 0x462   : > { %v4612_v28 = vadd.f32 %v4611_v25, %v4610_v23  ;;  %v4640_v36 = vadd.f32 %v4639_v59, %v4638_v26  ;;  %v3069_v51 = vadd.f32 %v4637_v46, %v3020_v41  ;;  %v5144_v46 = vld [vmem:[#allocation12 + $0x108] sm:$0xff]  }
 0x463   : > { %v4613_v27 = vpop.f32.mrf.mxu1  ;;  %v4641_v32 = vpop.f32.mrf.mxu0 }
 0x464   : > { %v3025_v33 = vadd.f32 %v4612_v28, %v4164_v31 }
 0x465   : > { %v4614_v29 = vpop.f32.mrf.mxu1  ;;  %v4642_v37 = vpop.f32.mrf.mxu0 }
 0x466   : > { %v4615_v63 = vadd.f32 %v4614_v29, %v4613_v27  ;;  %v3074_v40 = vadd.f32 %v4640_v36, %v3025_v33  ;;  %v4643_v42 = vadd.f32 %v4642_v37, %v4641_v32  ;;  %v5137_v36 = vld [vmem:[#allocation12 + $0x130] sm:$0xff]  }
 0x468   : > { %v3028_v39 = vadd.f32 %v4615_v63, %v4164_v31 }
 0x46a   : > { %v3077_v48 = vadd.f32 %v4643_v42, %v3028_v39  ;;  %v5138_v39 = vld [vmem:[#allocation12 + $0x128] sm:$0xff]   ;;  %v5141_v42 = vld [vmem:[#allocation12 + $0x120] sm:$0xff]  }
 0x477   : > { %v4798_v7 = vpop.f32.mrf.mxu1 }
 0x478   : > { %v3123_v43 = vadd.f32 %v4798_v7, %v3074_v40 }
 0x479   : > { %v3114_v45 = vpop.f32.mrf.mxu1 }
 0x47a   : > { %5171 = vtanh.f32 %v3123_v43  ;;  %v3115_v47 = vadd.f32 %v3114_v45, %v3066_v44  ;;  %v5143_v45 = vld [vmem:[#allocation12 + $0x110] sm:$0xff]  }
 0x47b   : > { %v4799_v49 = vpop.f32.mrf.mxu1 }
 0x47c   : > { %5173 = vtanh.f32 %v3115_v47  ;;  %v3126_v50 = vadd.f32 %v4799_v49, %v3077_v48  ;;  %v5145_v47 = vld [vmem:[#allocation12 + $0x100] sm:$0xff]  }
 0x47d   : > { %v3117_v52 = vpop.f32.mrf.mxu1 }
 0x47e   : > { %5175 = vtanh.f32 %v3126_v50  ;;  %v3118_v53 = vadd.f32 %v3117_v52, %v3069_v51 }
 0x480   : > { %5177 = vtanh.f32 %v3118_v53 }
 0x487   : > { %v5172_v54 = vpop.eup %5171 }
 0x488   : > { %3135 = vst [vmem:[#allocation2 + $0x18] sm:$0xff] %v5172_v54  ;;  %v4380_v55 = vpack.c.bf16 %v5172_v54, %v5172_v54 }
 0x489   : > { %v5174_v56 = vpop.eup %5173 }
 0x48a   : > { %3133 = vst [vmem:[#allocation2 + $0x8] sm:$0xff] %v5174_v56  ;;  %v4378_v57 = vpack.c.bf16 %v5174_v56, %v5174_v56  ;;  %3207 = vst [vmem:[#allocation4 + $0x30] sm:$0xf] %v4380_v55 }
 0x48b   : > { %v5176_v58 = vpop.eup %5175 }
 0x48c   : > { %3136 = vst [vmem:[#allocation2 + $0x20] sm:$0xff] %v5176_v58  ;;  %3205 = vst [vmem:[#allocation4 + $0x8] sm:$0xf] %v4378_v57  ;;  %v4381_v60 = vpack.c.bf16 %v5176_v58, %v5176_v58 }
 0x48d   : > { %v5178_v61 = vpop.eup %5177 }
 0x48e   : > { %3134 = vst [vmem:[#allocation2 + $0x10] sm:$0xff] %v5178_v61  ;;  %v4379_v62 = vpack.c.bf16 %v5178_v61, %v5178_v61  ;;  %3208 = vst [vmem:[#allocation4 + $0x44] sm:$0xf] %v4381_v60 }
 0x490   : > { %3206 = vst [vmem:[#allocation4 + $0x1c] sm:$0xf] %v4379_v62 }
 0x491   : > { %v3137_v0 = vld [vmem:[#allocation2 + $0x6] sm:$0xff] }
 0x492   : > { %v3161_v1 = vld [vmem:[#allocation2 + $0x7] sm:$0xff]  ;;  %v4370_v2 = vpack.c.bf16 %v3137_v0, %v3137_v0 }
 0x493   : > { %v4374_v3 = vpack.c.bf16 %v3161_v1, %v3161_v1  ;;  %v3140_v4 = vld [vmem:[#allocation2 + $0x1e] sm:$0xff] }
 0x494   : > { %v3164_v5 = vld [vmem:[#allocation2 + $0x1f] sm:$0xff]  ;;  %3157 = vst [vmem:[#allocation4] sm:$0xf] %v4370_v2  ;;  %v4373_v8 = vpack.c.bf16 %v3140_v4, %v3140_v4 }
 0x495   : > { %v3211_v6 = vld [vmem:[#allocation2 + $0x19] sm:$0xff]  ;;  %3181 = vst [vmem:[#allocation4 + $0x4] sm:$0xf] %v4374_v3  ;;  %v4377_v9 = vpack.c.bf16 %v3164_v5, %v3164_v5  ;;  %v3212_v10 = vld [vmem:[#allocation2 + $0x21] sm:$0xff]  ;;  %v3138_v14 = vld [vmem:[#allocation2 + $0xe] sm:$0xff] }
 0x496   : > { %v4384_v11 = vpack.c.bf16 %v3211_v6, %v3211_v6  ;;  %v3235_v12 = vld [vmem:[#allocation2 + $0x1a] sm:$0xff]  ;;  %v3236_v13 = vld [vmem:[#allocation2 + $0x22] sm:$0xff]  ;;  %v3162_v16 = vld [vmem:[#allocation2 + $0xf] sm:$0xff]  ;;  %v4385_v18 = vpack.c.bf16 %v3212_v10, %v3212_v10  ;;  %v4371_v21 = vpack.c.bf16 %v3138_v14, %v3138_v14  ;;  %3160 = vst [vmem:[#allocation4 + $0x3c] sm:$0xf] %v4373_v8 }
 0x497   : > { %v3209_v17 = vld [vmem:[#allocation2 + $0x9] sm:$0xff]  ;;  %v4388_v19 = vpack.c.bf16 %v3235_v12, %v3235_v12  ;;  %v4389_v20 = vpack.c.bf16 %v3236_v13, %v3236_v13  ;;  %v4375_v22 = vpack.c.bf16 %v3162_v16, %v3162_v16  ;;  %v3210_v23 = vld [vmem:[#allocation2 + $0x11] sm:$0xff]  ;;  %3184 = vst [vmem:[#allocation4 + $0x40] sm:$0xf] %v4377_v9  ;;  %v4235_v3 = vld [vmem:[%s5580_s10] ss:$0 sm:$0xff] }
 0x498   : > { %v4382_v24 = vpack.c.bf16 %v3209_v17, %v3209_v17  ;;  %v3139_v25 = vld [vmem:[#allocation2 + $0x16] sm:$0xff]  ;;  %3231 = vst [vmem:[#allocation4 + $0x34] sm:$0xf] %v4384_v11  ;;  %v4383_v27 = vpack.c.bf16 %v3210_v23, %v3210_v23  ;;  %3232 = vst [vmem:[#allocation4 + $0x48] sm:$0xf] %v4385_v18  ;;  %v3233_v29 = vld [vmem:[#allocation2 + $0xa] sm:$0xff] }
 0x499   : > { %v3163_v26 = vld [vmem:[#allocation2 + $0x17] sm:$0xff]  ;;  %v4372_v59 = vpack.c.bf16 %v3139_v25, %v3139_v25  ;;  %3255 = vst [vmem:[#allocation4 + $0x38] sm:$0xf] %v4388_v19  ;;  %3256 = vst [vmem:[#allocation4 + $0x4c] sm:$0xf] %v4389_v20  ;;  %v4386_v31 = vpack.c.bf16 %v3233_v29, %v3233_v29 }
 0x49a   : > { %v4376_v28 = vpack.c.bf16 %v3163_v26, %v3163_v26  ;;  %v3234_v30 = vld [vmem:[#allocation2 + $0x12] sm:$0xff]  ;;  %3158 = vst [vmem:[#allocation4 + $0x14] sm:$0xf] %v4371_v21  ;;  %3182 = vst [vmem:[#allocation4 + $0x18] sm:$0xf] %v4375_v22  ;;  %v3349_v22 = vld [vmem:[%s5517_s12] sm:$0xff] }
 0x49b   : > { %3229 = vst [vmem:[#allocation4 + $0xc] sm:$0xf] %v4382_v24  ;;  %v4387_v32 = vpack.c.bf16 %v3234_v30, %v3234_v30  ;;  %3230 = vst [vmem:[#allocation4 + $0x20] sm:$0xf] %v4383_v27  ;;  %v5129_v34 = vld [vmem:[#allocation4 + $0x8] ss:$20 sps:$4 sm:$0xff]  }
 0x49c   : > { %3159 = vst [vmem:[#allocation4 + $0x28] sm:$0xf] %v4372_v59  ;;  %3183 = vst [vmem:[#allocation4 + $0x2c] sm:$0xf] %v4376_v28  ;;  %v5139_v44 = vld [vmem:[#allocation4 + $0x30] ss:$20 sps:$4 sm:$0xff]  }
 0x49d   : > { %3253 = vst [vmem:[#allocation4 + $0x10] sm:$0xf] %v4386_v31  ;;  %3254 = vst [vmem:[#allocation4 + $0x24] sm:$0xf] %v4387_v32  ;;  %v3351_v16 = vld [vmem:[%s5517_s12 + $0x10] sm:$0xff]  ;;  %v3352_v59 = vld [vmem:[%s5517_s12 + $0x18] sm:$0xff] }
 0x49e   : > { %v3266_v7 = vld [vmem:[#allocation4 + $0x3c] sm:$0xff]  ;;  %v3350_v32 = vld [vmem:[%s5517_s12 + $0x8] sm:$0xff] }
 0x49f   : > { %v5135_v38 = vld [vmem:[#allocation4 + $0x34] ss:$20 sps:$4 sm:$0xff]  }
 0x4a0   : > { %v5146_v48 = vld [vmem:[#allocation4 + $0x38] ss:$20 sps:$4 sm:$0xff]  }
 0x4a1   : > { %v5126_v33 = vld [vmem:[#allocation4] ss:$20 sps:$4 sm:$0xff]   ;;  %v5128_v63 = vld [vmem:[#allocation4 + $0x4] ss:$20 sps:$4 sm:$0xff]  }
 0x4a2   : > { %3684 = vmatprep.mubr.bf16.mxu0 %v5128_v63  ;;  %v5131_v35 = vld [vmem:[#allocation4 + $0xc] ss:$20 sps:$4 sm:$0xff]  }
 0x4a3   : > { %3685 = vmatmul.mubr.bf16.vlgmr.msra.gmra.mxu0 %v5126_v33  ;;  %v5133_v37 = vld [vmem:[#allocation4 + $0x2c] ss:$20 sps:$4 sm:$0xff]   ;;  %3733 = vmatprep.mubr.bf16.mxu1 %v5131_v35 }
 0x4a4   : > { %4801 = vmatpush3.bf16.msra.mxu0 %v5548_v15  ;;  %3734 = vmatmul.mubr.bf16.vlgmr.msra.gmra.mxu1 %v5129_v34  ;;  %v3263_v40 = vld [vmem:[#allocation4 + $0x28] sm:$0xff]  ;;  %v5140_v43 = vld [vmem:[#allocation4 + $0x10] ss:$20 sps:$4 sm:$0xff]  }
 0x4a5   : > { %3692 = vmatprep.mubr.bf16.mxu0 %v5133_v37  ;;  %3741 = vmatprep.mubr.bf16.mxu1 %v5135_v38  ;;  %v4241_v41 = vcombine.low %v3263_v40, %v3266_v7  ;;  %v5142_v15 = vld [vmem:[#allocation12 + $0x118] sm:$0xff]  }
 0x4a6   : > { %4802 = vmatprep.subr.bf16.mxu0 %v5137_v36 }
 0x4a8   : > { %4803 = vmatpush3.bf16.msra.mxu0 %v5137_v36 }
 0x4a9   : > { %4804 = vmatprep.subr.bf16.mxu0 %v5138_v39 }
 0x4ab   : > { %3693 = vmatmul.mubr.bf16.gmra.mxu0 %v4241_v41 }
 0x4ac   : > { %4805 = vmatpush3.bf16.msra.mxu0 %v5138_v39  ;;  %4816 = vmatprep.mubr.bf16.mxu0 %v5140_v43 }
 0x4ad   : > { %3742 = vmatmul.mubr.bf16.gmra.mxu1 %v5139_v44  ;;  %4806 = vmatprep.subr.bf16.mxu0 %v5141_v42 }
 0x4b0   : > { %4807 = vmatpush3.bf16.msra.mxu0 %v5141_v42 }
 0x4b1   : > { %4808 = vmatprep.subr.bf16.mxu0 %v5142_v15 }
 0x4b4   : > { %4809 = vmatpush3.bf16.msra.mxu0 %v5142_v15 }
 0x4b5   : > { %4810 = vmatprep.subr.bf16.mxu0 %v5143_v45 }
 0x4b8   : > { %4811 = vmatpush3.bf16.msra.mxu0 %v5143_v45 }
 0x4b9   : > { %4812 = vmatprep.subr.bf16.mxu0 %v5144_v46 }
 0x4bc   : > { %4813 = vmatpush3.bf16.msra.mxu0 %v5144_v46 }
 0x4bd   : > { %4814 = vmatprep.subr.bf16.mxu0 %v5145_v47 }
 0x4c0   : > { %4815 = vmatpush3.bf16.msra.mxu0 %v5145_v47 }
 0x4c3   : > { %4817 = vmatmul.mubr.bf16.vlgmr.msra.gmra.mxu0 %v5146_v48 }
 0x563   : > { %v4670_v49 = vpop.f32.mrf.mxu0 }
 0x564   : > { %v4698_v50 = vpop.f32.mrf.mxu1 }
 0x565   : > { %v4671_v51 = vpop.f32.mrf.mxu0 }
 0x566   : > { %v4699_v53 = vpop.f32.mrf.mxu1  ;;  %v4672_v2 = vadd.f32 %v4671_v51, %v4670_v49 }
 0x567   : > { %v4673_v52 = vpop.f32.mrf.mxu0  ;;  %v4700_v12 = vadd.f32 %v4699_v53, %v4698_v50 }
 0x568   : > { %v4701_v55 = vpop.f32.mrf.mxu1  ;;  %v3687_v8 = vadd.f32 %v4672_v2, %v4235_v3 }
 0x569   : > { %v4674_v54 = vpop.f32.mrf.mxu0 }
 0x56a   : > { %v4702_v57 = vpop.f32.mrf.mxu1  ;;  %v4675_v9 = vadd.f32 %v4674_v54, %v4673_v52  ;;  %v3736_v21 = vadd.f32 %v4700_v12, %v3687_v8 }
 0x56b   : > { %v4676_v56 = vpop.f32.mrf.mxu0  ;;  %v4703_v24 = vadd.f32 %v4702_v57, %v4701_v55 }
 0x56c   : > { %v3690_v18 = vadd.f32 %v4675_v9, %v4235_v3 }
 0x56d   : > { %v4677_v58 = vpop.f32.mrf.mxu0  ;;  %v4704_v60 = vpop.f32.mrf.mxu1 }
 0x56e   : > { %v4678_v0 = vadd.f32 %v4677_v58, %v4676_v56  ;;  %v3739_v31 = vadd.f32 %v4703_v24, %v3690_v18 }
 0x56f   : > { %v4679_v61 = vpop.f32.mrf.mxu0  ;;  %v4705_v62 = vpop.f32.mrf.mxu1 }
 0x570   : > { %v3695_v5 = vadd.f32 %v4678_v0, %v4235_v3  ;;  %v4706_v10 = vadd.f32 %v4705_v62, %v4704_v60 }
 0x571   : > { %v4680_v1 = vpop.f32.mrf.mxu0  ;;  %v4707_v4 = vpop.f32.mrf.mxu1 }
 0x572   : > { %v4681_v6 = vadd.f32 %v4680_v1, %v4679_v61  ;;  %v3744_v14 = vadd.f32 %v4706_v10, %v3695_v5 }
 0x573   : > { %v4708_v11 = vpop.f32.mrf.mxu1 }
 0x574   : > { %v3698_v13 = vadd.f32 %v4681_v6, %v4235_v3  ;;  %v4709_v19 = vadd.f32 %v4708_v11, %v4707_v4 }
 0x576   : > { %v3747_v27 = vadd.f32 %v4709_v19, %v3698_v13 }
 0x583   : > { %v4818_v17 = vpop.f32.mrf.mxu0 }
 0x584   : > { %v3793_v20 = vadd.f32 %v4818_v17, %v3744_v14 }
 0x585   : > { %v3784_v23 = vpop.f32.mrf.mxu0 }
 0x586   : > { %v3801_v25 = vadd.f32 %v3793_v20, %v3351_v16  ;;  %v3785_v26 = vadd.f32 %v3784_v23, %v3736_v21 }
 0x587   : > { %v4819_v28 = vpop.f32.mrf.mxu0 }
 0x588   : > { %3805 = vst [vmem:[%s459_s28 + $0x10] sm:$0xff] %v3801_v25  ;;  %v3799_v29 = vadd.f32 %v3785_v26, %v3349_v22  ;;  %v3796_v30 = vadd.f32 %v4819_v28, %v3747_v27 }
 0x589   : > { %v3787_v33 = vpop.f32.mrf.mxu0 }
 0x58a   : > { %3803 = vst [vmem:[%s459_s28] sm:$0xff] %v3799_v29  ;;  %v3802_v63 = vadd.f32 %v3796_v30, %v3352_v59  ;;  %v3788_v34 = vadd.f32 %v3787_v33, %v3739_v31 }
 0x58c   : > { %3806 = vst [vmem:[%s459_s28 + $0x18] sm:$0xff] %v3802_v63  ;;  %v3800_v35 = vadd.f32 %v3788_v34, %v3350_v32 }
 0x58e   : > { %3804 = vst [vmem:[%s459_s28 + $0x8] sm:$0xff] %v3800_v35 }
 0x58f PF: > { %s24_s17 = sadd.s32 1, %s5327_s17  }
 0x590   : > { %p21_p3 = scmp.ge.s32.totalorder %s24_s17, 4  }
 0x592   :  { %23 = sbr.rel (!%p21_p3) target bundleno = 3 (0x3), region = 115 }
 0x597   :  { %3828 = vsyncpa [#allocation6], 1 }
 0x598   :  { %3830 = vsyncpa [#allocation6 + $0x1], 1 }
 0x599   :  { %3831 = vsyncpa [#allocation8], 1 }
 0x59a   :  { %3832 = vsyncpa [#allocation11], 1 }

</bundles_post_ra>
